<compile_context>
chip_gen: v7x
topology: tpu7x:2x2x1
jax: 0.10.0
libtpu: 0.0.40
codegen_flags: <defaults>
</compile_context>

<pallas_src>
import jax
import jax.numpy as jnp
from jax.experimental import pallas as pl
from jax.experimental.pallas import tpu as pltpu

BN_EPS = 1e-5   # PyTorch nn.BatchNorm1d default eps
LANE = 128
SUBLANE = 8


def _round_up(x, m):
    return ((x + m - 1) // m) * m


# --------------------------------------------------------------------------
# Pallas kernel: ActionHeadClassification on pooled features.
# Grid = (n_splits, n_h): axis 0 ('parallel') shards independent H chunks
# across TensorCores, axis 1 ('arbitrary') tiles H within a chunk and
# accumulates fc2 partials directly into the resident output block.
# --------------------------------------------------------------------------
def _action_head_kernel(x_ref, w1_ref, b1_ref, w2_ref, out_ref):
    j = pl.program_id(1)

    # fc1 tile (eval-mode BN folded into w1/b1): bf16 MXU inputs, f32 accum.
    h = jnp.dot(x_ref[...], w1_ref[...],
                preferred_element_type=jnp.float32) + b1_ref[...]   # (Np, tile_h)
    h = jnp.maximum(h, 0.0)                                          # ReLU

    # fc2 partial contraction for this H tile.
    partial = jnp.dot(h.astype(jnp.bfloat16), w2_ref[...],
                      preferred_element_type=jnp.float32)            # (Np, Kp)

    @pl.when(j == 0)
    def _():
        out_ref[...] = partial

    @pl.when(j != 0)
    def _():
        out_ref[...] += partial


# --------------------------------------------------------------------------
# One-time (model-load-time) weight preparation.  NOT in the per-call path.
# --------------------------------------------------------------------------
def prepare_head_params(params):
    """Fold eval-mode BatchNorm1d into fc1, pad D/H/K to 128 multiples, and
    cast weights to bf16 once."""
    D, H = params['w1'].shape
    K = params['w2'].shape[1]
    Dp, Hp, Kp = _round_up(D, LANE), _round_up(H, LANE), _round_up(K, LANE)

    # bn(x@w1 + b1) = x @ (w1*s) + ((b1 - rmean)*s + beta),  s = g*rsqrt(rv+eps)
    s = params['bn_gamma'][0] * jax.lax.rsqrt(params['bn_rvar'][0] + BN_EPS)
    w1f = params['w1'] * s[None, :]
    b1f = (params['b1'][0] - params['bn_rmean'][0]) * s + params['bn_beta'][0]

    return {
        'w1': jnp.pad(w1f, ((0, Dp - D), (0, Hp - H))).astype(jnp.bfloat16),
        'b1': jnp.pad(b1f, (0, Hp - H)).reshape(1, Hp).astype(jnp.float32),
        'w2': jnp.pad(params['w2'], ((0, Hp - H), (0, Kp - K))).astype(jnp.bfloat16),
        'b2': jnp.pad(params['b2'][0], (0, Kp - K)).astype(jnp.float32),
        'dims': (D, H, K, Dp, Hp, Kp),
    }


def _choose_tiling(Hp, Dp, Kp):
    """Return (n_splits, n_h, tile_h) with n_splits * n_h * tile_h == Hp.

    Small weights -> a single grid step (no per-step pipeline overhead).
    Large weights -> ~10 MiB bf16 weight tiles (double-buffered stays well
    under v7x's 32 MiB scoped VMEM; comfortable on v5e/v6e), and an even
    2-way split on the leading 'parallel' axis to feed both v7x TCs.
    """
    bytes_per_h = 2 * (Dp + Kp)                  # bf16 w1 column + w2 row
    if Hp * bytes_per_h <= (4 << 20):
        return 1, 1, Hp
    budget = 10 << 20
    tile_h = max(LANE, min(Hp, (budget // bytes_per_h) // LANE * LANE))
    while Hp % tile_h:                           # Hp is a multiple of 128
        tile_h -= LANE
    n_tiles = Hp // tile_h
    if n_tiles % 2 == 0:
        return 2, n_tiles // 2, tile_h
    return 1, n_tiles, tile_h


def action_head_pallas(pooled, head):
    """pooled: (N, D) f32 pooled backbone features -> logits (N, num_classes)."""
    N, D = pooled.shape
    D0, H, K, Dp, Hp, Kp = head['dims']
    assert D == D0, (D, D0)
    Np = _round_up(N, SUBLANE)

    # Only per-call prep: pad + cast the tiny (N, D) pooled tensor to bf16.
    x = jnp.pad(pooled, ((0, Np - N), (0, Dp - D))).astype(jnp.bfloat16)

    n_splits, n_h, tile_h = _choose_tiling(Hp, Dp, Kp)

    # Double-buffered weight tiles + resident pooled/output blocks, with headroom.
    vmem_bytes = (2 * Dp * tile_h * 2        # w1 tiles (bf16, double-buffered)
                  + 2 * tile_h * Kp * 2      # w2 tiles
                  + 2 * tile_h * 4           # b1 tiles
                  + 2 * Np * Dp * 2          # pooled features
                  + 2 * Np * Kp * 4)         # output block
    vmem_limit = int(min(64 << 20, max(16 << 20, 1.5 * vmem_bytes)))

    cost = pl.CostEstimate(
        flops=2 * Np * Dp * Hp + 2 * Np * Hp * Kp,
        transcendentals=0,
        bytes_accessed=(x.size * 2 + head['w1'].size * 2 + head['w2'].size * 2
                        + head['b1'].size * 4 + n_splits * Np * Kp * 4))

    partials = pl.pallas_call(
        _action_head_kernel,
        out_shape=jax.ShapeDtypeStruct((n_splits, Np, Kp), jnp.float32),
        grid=(n_splits, n_h),
        in_specs=[
            # pooled features: constant block index -> fetched once, resident
            pl.BlockSpec((Np, Dp), lambda c, j: (0, 0)),
            pl.BlockSpec((Dp, tile_h), lambda c, j: (0, c * n_h + j)),   # fc1 W tile
            pl.BlockSpec((1, tile_h), lambda c, j: (0, c * n_h + j)),    # fc1 bias (BN folded)
            pl.BlockSpec((tile_h, Kp), lambda c, j: (c * n_h + j, 0)),   # fc2 W tile
        ],
        out_specs=pl.BlockSpec((None, Np, Kp), lambda c, j: (c, 0, 0)),
        compiler_params=pltpu.CompilerParams(
            dimension_semantics=("parallel", "arbitrary"),
            vmem_limit_bytes=vmem_limit),
        cost_estimate=cost,
    )(x, head['w1'], head['b1'], head['w2'])

    # Tiny XLA epilogue: combine per-core partials, add fc2 bias, un-pad.
    logits = partials.sum(axis=0) + head['b2']
    return logits[:N, :K]


# --------------------------------------------------------------------------
# Parameter init (deterministic, in-script) and full ActionNet forward.
# --------------------------------------------------------------------------
def init_params(key, dim_rep=32, num_classes=60, num_joints=17, in_ch=3):
    hidden_dim = max(dim_rep * 2, 1024)     # same rule as ActionHeadClassification
    d_in = dim_rep * num_joints
    ks = jax.random.split(key, 6)
    return {
        # backbone stand-in: per-joint linear projection (x, y, conf) -> dim_rep
        'bb_w': jax.random.normal(ks[0], (in_ch, dim_rep), jnp.float32) * 0.1,
        'bb_b': jax.random.normal(ks[1], (dim_rep,), jnp.float32) * 0.01,
        # head
        'w1': jax.random.normal(ks[2], (d_in, hidden_dim), jnp.float32)
              * (1.0 / jnp.sqrt(d_in)),
        'b1': jax.random.normal(ks[3], (1, hidden_dim), jnp.float32) * 0.01,
        'bn_gamma': jnp.full((1, hidden_dim), 1.05, jnp.float32),
        'bn_beta':  jnp.full((1, hidden_dim), 0.02, jnp.float32),
        'bn_rmean': jnp.full((1, hidden_dim), 0.01, jnp.float32),
        'bn_rvar':  jnp.full((1, hidden_dim), 0.90, jnp.float32),
        'w2': jax.random.normal(ks[4], (hidden_dim, num_classes), jnp.float32)
              * (1.0 / jnp.sqrt(hidden_dim)),
        'b2': jax.random.normal(ks[5], (1, num_classes), jnp.float32) * 0.01,
    }


def action_net_forward(params, head, x, num_joints=17):
    """x: (N, M, T, J, C) with C = 3 (x, y, frame_conf). Returns (N, num_classes).

    Backbone stand-in + (M, T) mean-pool run in plain XLA; only the pooled
    (N, J*dim_rep) tensor enters the Pallas head kernel.
    """
    N, M, T, J, C = x.shape
    xr = x.reshape(N * M, T, J, C)
    # TODO(synk): real backbone (DSTformer.get_representation) is an external
    # module; a deterministic per-joint linear projection stands in for it.
    feat = jnp.einsum('btjc,cd->btjd', xr, params['bb_w']) + params['bb_b']
    dim_rep = feat.shape[-1]
    feat = feat.reshape(N, M, T, num_joints, dim_rep)
    # permute(0,1,3,4,2).mean(-1).reshape(N,M,-1).mean(1) == mean over (M, T)
    # of the (J, dim_rep)-flattened features (flatten commutes with the means).
    pooled = feat.mean(axis=(1, 2)).reshape(N, num_joints * dim_rep)
    return action_head_pallas(pooled, head)


def action_net_reference(params, x, num_joints=17):
    """Pure-JAX f32 reference mirroring the PyTorch forward step-by-step
    (dropout p=0 is a no-op; BatchNorm1d in eval mode uses running stats)."""
    N, M, T, J, C = x.shape
    xr = x.reshape(N * M, T, J, C)
    feat = jnp.einsum('btjc,cd->btjd', xr, params['bb_w']) + params['bb_b']
    feat = feat.reshape(N, M, T, num_joints, -1)
    feat = jnp.transpose(feat, (0, 1, 3, 4, 2)).mean(-1)      # (N, M, J, dim_rep)
    feat = feat.reshape(N, M, -1).mean(1)                     # (N, J*dim_rep)
    h = feat @ params['w1'] + params['b1'][0]
    h = ((h - params['bn_rmean'][0])
         / jnp.sqrt(params['bn_rvar'][0] + BN_EPS)
         * params['bn_gamma'][0] + params['bn_beta'][0])
    h = jnp.maximum(h, 0.0)
    return h @ params['w2'] + params['b2'][0]


if __name__ == "__main__":
    key = jax.random.PRNGKey(0)
    pkey, xkey = jax.random.split(key)

    N, M, T, J, C = 2, 2, 8, 17, 3
    dim_rep, num_classes = 32, 60

    params = init_params(pkey, dim_rep=dim_rep, num_classes=num_classes,
                         num_joints=J, in_ch=C)
    # Model-load-time prep (BN fold, padding, bf16 cast) — done once, reused.
    head = jax.block_until_ready(prepare_head_params(params))

    x = jax.random.normal(xkey, (N, M, T, J, C), jnp.float32)

    out = action_net_forward(params, head, x, num_joints=J)
    out = jax.block_until_ready(out)

    ref = action_net_reference(params, x, num_joints=J)
    assert out.shape == (N, num_classes), out.shape
    # bf16 weights + bf16 pooled activations in the kernel vs. pure-f32 ref
    assert jnp.allclose(out, ref, atol=1e-2, rtol=1e-2), \
        f"max abs err {jnp.max(jnp.abs(out - ref))}"

    print("KERNEL_OK")
</pallas_src>

<mosaic_0001>
module attributes {stable_mosaic.version = 11 : i64} {
  func.func @_action_head_kernel(%arg0: i32, %arg1: i32, %arg2: memref<8x640xbf16, #tpu.memory_space<vmem>>, %arg3: memref<640x1024xbf16, #tpu.memory_space<vmem>>, %arg4: memref<1x1024xf32, #tpu.memory_space<vmem>>, %arg5: memref<1024x128xbf16, #tpu.memory_space<vmem>>, %arg6: memref<1x8x128xf32, #tpu.memory_space<vmem>>) attributes {dimension_semantics = [#tpu.dimension_semantics<parallel>, #tpu.dimension_semantics<arbitrary>], iteration_bounds = array<i64: 1, 1>, scalar_prefetch = 0 : i64, scratch_operands = 0 : i64, tpu.core_type = #tpu.core_type<tc>, window_params = [{pipeline_mode = #tpu.pipeline_mode<synchronous>, transform_indices = @transform_0, window_bounds = array<i64: 8, 640>}, {transform_indices = @transform_1, window_bounds = array<i64: 640, 1024>}, {transform_indices = @transform_2, window_bounds = array<i64: 1, 1024>}, {transform_indices = @transform_3, window_bounds = array<i64: 1024, 128>}, {transform_indices = @transform_4, window_bounds = array<i64: 1, 8, 128>}]} {
    %c0 = arith.constant 0 : index
    %c0_0 = arith.constant 0 : index
    %0 = vector.load %arg2[%c0, %c0_0] : memref<8x640xbf16, #tpu.memory_space<vmem>>, vector<8x640xbf16>
    %c0_1 = arith.constant 0 : index
    %c0_2 = arith.constant 0 : index
    %1 = vector.load %arg3[%c0_1, %c0_2] : memref<640x1024xbf16, #tpu.memory_space<vmem>>, vector<640x1024xbf16>
    %cst = arith.constant dense<0.000000e+00> : vector<8x1024xf32>
    %2 = tpu.matmul %0, %1, %cst {dimension_numbers = #tpu.dot_dimension_numbers<[1], [0], [0], [1], [0, 0, 1, 1], [], []>} : vector<8x640xbf16>, vector<640x1024xbf16>, vector<8x1024xf32> -> vector<8x1024xf32>
    %c0_3 = arith.constant 0 : index
    %c0_4 = arith.constant 0 : index
    %3 = vector.load %arg4[%c0_3, %c0_4] : memref<1x1024xf32, #tpu.memory_space<vmem>>, vector<1x1024xf32>
    %4 = vector.broadcast %3 : vector<1x1024xf32> to vector<8x1024xf32>
    %5 = arith.addf %2, %4 : vector<8x1024xf32>
    %cst_5 = arith.constant 0.000000e+00 : f32
    %6 = vector.broadcast %cst_5 : f32 to vector<8x1024xf32>
    %7 = arith.maximumf %5, %6 : vector<8x1024xf32>
    %8 = arith.truncf %7 : vector<8x1024xf32> to vector<8x1024xbf16>
    %c0_6 = arith.constant 0 : index
    %c0_7 = arith.constant 0 : index
    %9 = vector.load %arg5[%c0_6, %c0_7] : memref<1024x128xbf16, #tpu.memory_space<vmem>>, vector<1024x128xbf16>
    %cst_8 = arith.constant dense<0.000000e+00> : vector<8x128xf32>
    %10 = tpu.matmul %8, %9, %cst_8 {dimension_numbers = #tpu.dot_dimension_numbers<[1], [0], [0], [1], [0, 0, 1, 1], [], []>} : vector<8x1024xbf16>, vector<1024x128xbf16>, vector<8x128xf32> -> vector<8x128xf32>
    %c0_i32 = arith.constant 0 : i32
    %11 = arith.cmpi eq, %arg1, %c0_i32 : i32
    %12 = arith.extui %11 : i1 to i32
    %c0_i32_9 = arith.constant 0 : i32
    %13 = arith.cmpi ne, %12, %c0_i32_9 : i32
    scf.if %13 {
      %c0_12 = arith.constant 0 : index
      %c0_13 = arith.constant 0 : index
      %c0_14 = arith.constant 0 : index
      %17 = vector.load %arg6[%c0_12, %c0_13, %c0_14] : memref<1x8x128xf32, #tpu.memory_space<vmem>>, vector<1x8x128xf32>
      %18 = vector.shape_cast %17 : vector<1x8x128xf32> to vector<8x128xf32>
      %19 = vector.shape_cast %10 : vector<8x128xf32> to vector<1x8x128xf32>
      tpu.vector_store %arg6[%c0_12, %c0_13, %c0_14], %19 {strides = array<i32>} : memref<1x8x128xf32, #tpu.memory_space<vmem>>, vector<1x8x128xf32>,
    } else {
    }
    %c0_i32_10 = arith.constant 0 : i32
    %14 = arith.cmpi ne, %arg1, %c0_i32_10 : i32
    %15 = arith.extui %14 : i1 to i32
    %c0_i32_11 = arith.constant 0 : i32
    %16 = arith.cmpi ne, %15, %c0_i32_11 : i32
    scf.if %16 {
      %c0_12 = arith.constant 0 : index
      %c0_13 = arith.constant 0 : index
      %c0_14 = arith.constant 0 : index
      %17 = vector.load %arg6[%c0_12, %c0_13, %c0_14] : memref<1x8x128xf32, #tpu.memory_space<vmem>>, vector<1x8x128xf32>
      %18 = vector.shape_cast %17 : vector<1x8x128xf32> to vector<8x128xf32>
      %19 = arith.addf %18, %10 : vector<8x128xf32>
      %c0_15 = arith.constant 0 : index
      %c0_16 = arith.constant 0 : index
      %c0_17 = arith.constant 0 : index
      %20 = vector.load %arg6[%c0_15, %c0_16, %c0_17] : memref<1x8x128xf32, #tpu.memory_space<vmem>>, vector<1x8x128xf32>
      %21 = vector.shape_cast %20 : vector<1x8x128xf32> to vector<8x128xf32>
      %22 = vector.shape_cast %19 : vector<8x128xf32> to vector<1x8x128xf32>
      tpu.vector_store %arg6[%c0_15, %c0_16, %c0_17], %22 {strides = array<i32>} : memref<1x8x128xf32, #tpu.memory_space<vmem>>, vector<1x8x128xf32>,
    } else {
    }
    return
  }
  func.func @transform_0(%arg0: i32, %arg1: i32) -> (i32, i32) {
    %c0_i32 = arith.constant 0 : i32
    %c0_i32_0 = arith.constant 0 : i32
    %c0_i32_1 = arith.constant 0 : i32
    return %c0_i32, %c0_i32_0 : i32, i32
  }
  func.func @transform_1(%arg0: i32, %arg1: i32) -> (i32, i32) {
    %c1_i32 = arith.constant 1 : i32
    %0 = arith.muli %arg0, %c1_i32 : i32
    %1 = arith.addi %0, %arg1 : i32
    %c0_i32 = arith.constant 0 : i32
    %c0_i32_0 = arith.constant 0 : i32
    return %c0_i32, %1 : i32, i32
  }
  func.func @transform_2(%arg0: i32, %arg1: i32) -> (i32, i32) {
    %c1_i32 = arith.constant 1 : i32
    %0 = arith.muli %arg0, %c1_i32 : i32
    %1 = arith.addi %0, %arg1 : i32
    %c0_i32 = arith.constant 0 : i32
    %c0_i32_0 = arith.constant 0 : i32
    return %c0_i32, %1 : i32, i32
  }
  func.func @transform_3(%arg0: i32, %arg1: i32) -> (i32, i32) {
    %c1_i32 = arith.constant 1 : i32
    %0 = arith.muli %arg0, %c1_i32 : i32
    %1 = arith.addi %0, %arg1 : i32
    %c0_i32 = arith.constant 0 : i32
    %c0_i32_0 = arith.constant 0 : i32
    return %1, %c0_i32 : i32, i32
  }
  func.func @transform_4(%arg0: i32, %arg1: i32) -> (i32, i32, i32) {
    %c0_i32 = arith.constant 0 : i32
    %c0_i32_0 = arith.constant 0 : i32
    %c0_i32_1 = arith.constant 0 : i32
    return %arg0, %c0_i32, %c0_i32_0 : i32, i32, i32
  }
}

</mosaic_0001>

<bundles_post_ra>
// kernel: tpu_custom_call.1
= control target key start
LH: loop header
LB: loop body
LE: loop exit
PB: predicated region body
PF: predicated region fallthrough
CT: control target
= control target key end

     0   :  { %9 = vsyncpa [#allocation3], 0  ;;  %s4155_s0 = inlined_call_operand.hbm [shape: bf16[8,640], index: 0, kind: input, shape index: {}]   ;;  %s4156_s1 = inlined_call_operand.hbm [shape: bf16[640,1024], index: 1, kind: input, shape index: {}]   ;;  %s4157_s2 = inlined_call_operand.hbm [shape: f32[1,1024], index: 2, kind: input, shape index: {}]   ;;  %s4158_s3 = inlined_call_operand.hbm [shape: bf16[1024,128], index: 3, kind: input, shape index: {}]   ;;  %s4159_s4 = inlined_call_operand.hbm [shape: f32[1,8,128], index: 4, kind: output, shape index: {}]  }
   0x1   :  { %10 = vsyncpa [#allocation6], 0 }
   0x2   :  { %11 = vsyncpa [#allocation9], 0 }
   0x3   :  { %12 = vsyncpa [#allocation4], 0  ;;  %s3994_s15 = smov [#allocation5]   ;;  %s3876_s19 = scalar_lea.hbm %s4156_s1, 40960 }
   0x4   :  { %s32_s16 = sshll.u32 %s3994_s15, 4  ;;  %p3877_p0 = scmp.ne.s32.totalorder %s4156_s1, %s3876_s19  ;;  %s33_s16 = int_to_ptr.vmem [resolvable:$true] %s32_s16 }
   0x5   :  { %p3880_p1 = scmp.lt.u32.totalorder %s3876_s19, %s4156_s1 }
   0x7   :  { %p3882_p2 = pnand %p3880_p1, %p3877_p0 }
   0x9   :  { %3885 = shalt.err (!%p3882_p2)
}
   0xa   :  { %s3886_s24 = scalar_lea.vmem %s33_s16, 40960  ;;  %p3891_p4 = scmp.lt.s32.totalorder %s33_s16, %s33_s16 }
   0xb   :  { %p3887_p3 = scmp.ne.s32.totalorder %s33_s16, %s3886_s24  ;;  %p3892_p5 = scmp.lt.s32.totalorder %s3886_s24, %s3886_s24 }
   0xd   :  { %p3893_p6 = por %p3892_p5, %p3891_p4 }
   0xf   :  { %p3894_p7 = pnand %p3893_p6, %p3887_p3 }
  0x11   :  { %3897 = shalt.err (!%p3894_p7)
}
  0x12   :  { %s3995_s25 = smov 512   ;;  %s3996_s26 = smov 32  }
  0x13   :  { %38 = dma.hbm_to_vmem [thread:$0]  %s4156_s1, 40960, %s33_s16, [#allocation6], %s3995_s25, %s3995_s25, %s3996_s26  }
  0x14   :  { %s3997_s29 = smov [#allocation2]   ;;  %s3998_s5 = smov [#allocation7]  }
  0x15   :  { %s19_s30 = sshll.u32 %s3997_s29, 4  ;;  %s49_s6 = sshll.u32 %s3998_s5, 4  ;;  %s20_s30 = int_to_ptr.vmem [resolvable:$true] %s19_s30  ;;  %s50_s6 = int_to_ptr.vmem [resolvable:$true] %s49_s6 }
  0x16   :  { %s3898_s9 = scalar_lea.hbm %s4155_s0, 320 }
  0x17   :  { %p3899_p8 = scmp.ne.s32.totalorder %s4155_s0, %s3898_s9  ;;  %p3902_p9 = scmp.lt.u32.totalorder %s3898_s9, %s4155_s0 }
  0x19   :  { %p3904_p10 = pnand %p3902_p9, %p3899_p8 }
  0x1b   :  { %3907 = shalt.err (!%p3904_p10)
}
  0x1c   :  { %s3908_s1 = scalar_lea.vmem %s20_s30, 320  ;;  %p3913_p12 = scmp.lt.s32.totalorder %s20_s30, %s20_s30 }
  0x1d   :  { %p3909_p11 = scmp.ne.s32.totalorder %s20_s30, %s3908_s1  ;;  %p3914_p13 = scmp.lt.s32.totalorder %s3908_s1, %s3908_s1 }
  0x1f   :  { %p3915_p0 = por %p3914_p13, %p3913_p12 }
  0x21   :  { %p3916_p1 = pnand %p3915_p0, %p3909_p11 }
  0x23   :  { %3919 = shalt.err (!%p3916_p1)
}
  0x24   :  { %22 = dma.hbm_to_vmem [thread:$0]  %s4155_s0, 320, %s20_s30, [#allocation3]  }
  0x25   :  { %s3920_s18 = scalar_lea.hbm %s4157_s2, 128 }
  0x26   :  { %p3921_p2 = scmp.ne.s32.totalorder %s4157_s2, %s3920_s18  ;;  %p3924_p3 = scmp.lt.u32.totalorder %s3920_s18, %s4157_s2 }
  0x28   :  { %p3926_p4 = pnand %p3924_p3, %p3921_p2 }
  0x2a   :  { %3929 = shalt.err (!%p3926_p4)
}
  0x2b   :  { %s3930_s23 = scalar_lea.vmem %s50_s6, 128  ;;  %p3935_p6 = scmp.lt.s32.totalorder %s50_s6, %s50_s6 }
  0x2c   :  { %p3931_p5 = scmp.ne.s32.totalorder %s50_s6, %s3930_s23  ;;  %p3936_p7 = scmp.lt.s32.totalorder %s3930_s23, %s3930_s23 }
  0x2e   :  { %p3937_p8 = por %p3936_p7, %p3935_p6 }
  0x30   :  { %p3938_p9 = pnand %p3937_p8, %p3931_p5 }
  0x32   :  { %3941 = shalt.err (!%p3938_p9)
}
  0x33   :  { %52 = dma.hbm_to_vmem [thread:$0]  %s4157_s2, 128, %s50_s6, [#allocation6]  }
  0x34   :  { %s3999_s25 = smov [#allocation8]   ;;  %s3942_s29 = scalar_lea.hbm %s4158_s3, 8192 }
  0x35   :  { %s62_s26 = sshll.u32 %s3999_s25, 4  ;;  %p3943_p10 = scmp.ne.s32.totalorder %s4158_s3, %s3942_s29  ;;  %s63_s26 = int_to_ptr.vmem [resolvable:$true] %s62_s26 }
  0x36   :  { %p3946_p11 = scmp.lt.u32.totalorder %s3942_s29, %s4158_s3 }
  0x38   :  { %p3948_p12 = pnand %p3946_p11, %p3943_p10 }
  0x3a   :  { %3951 = shalt.err (!%p3948_p12)
}
  0x3b   :  { %s3952_s9 = scalar_lea.vmem %s63_s26, 8192  ;;  %p3957_p0 = scmp.lt.s32.totalorder %s63_s26, %s63_s26 }
  0x3c   :  { %p3953_p13 = scmp.ne.s32.totalorder %s63_s26, %s3952_s9  ;;  %p3958_p1 = scmp.lt.s32.totalorder %s3952_s9, %s3952_s9 }
  0x3e   :  { %p3959_p2 = por %p3958_p1, %p3957_p0 }
  0x40   :  { %p3960_p3 = pnand %p3959_p2, %p3953_p13 }
  0x42   :  { %3963 = shalt.err (!%p3960_p3)
}
  0x43   :  { %s4000_s2 = smov 64   ;;  %s4001_s6 = smov 4  }
  0x44   :  { %68 = dma.hbm_to_vmem [thread:$0]  %s4158_s3, 8192, %s63_s26, [#allocation9], %s4000_s2, %s4000_s2, %s4001_s6  }
  0x45   :  { %3986 = dma.done.wait [#allocation3], 320  }
  0x46   :  { %3987 = vsyncadd [#allocation3], 4294966976 }
  0x47   :  { %3988 = dma.done.wait [#allocation6], 41088  }
  0x48   :  { %3989 = vsyncadd [#allocation6], 4294926208 }
  0x49   :  { %3990 = dma.done.wait [#allocation9], 8192  }
  0x4a   :  { %3991 = vsyncadd [#allocation9], 4294959104  ;;  %v91_v0 = vld [vmem:[#allocation5] sm:$0xff]  ;;  %v92_v2 = vld [vmem:[#allocation5 + $0x8] sm:$0xff]  ;;  %s4003_s3 = smov [#allocation10]  }
  0x4b   :  { %v95_v1 = vld [vmem:[#allocation5 + $0x20] sm:$0xff]  ;;  %v96_v4 = vld [vmem:[#allocation5 + $0x28] sm:$0xff]  ;;  %s3269_s12 = sshll.u32 %s4003_s3, 4  ;;  %s3270_s12 = int_to_ptr.vmem [resolvable:$true] %s3269_s12 }
  0x4c   :  { %v3286_v3 = vcombine.high %v91_v0, %v95_v1  ;;  %v3285_v5 = vcombine.low %v91_v0, %v95_v1  ;;  %v99_v6 = vld [vmem:[#allocation5 + $0x40] sm:$0xff]  ;;  %v3288_v8 = vcombine.high %v92_v2, %v96_v4  ;;  %v3287_v9 = vcombine.low %v92_v2, %v96_v4  ;;  %v100_v11 = vld [vmem:[#allocation5 + $0x48] sm:$0xff]  ;;  %s3964_s13 = scalar_lea.vmem %s3270_s12, 128  ;;  %p3969_p5 = scmp.lt.s32.totalorder %s3270_s12, %s3270_s12 }
  0x4d   :  { %v103_v7 = vld [vmem:[#allocation5 + $0x60] sm:$0xff]  ;;  %v104_v12 = vld [vmem:[#allocation5 + $0x68] sm:$0xff]  ;;  %p3965_p4 = scmp.ne.s32.totalorder %s3270_s12, %s3964_s13  ;;  %p3970_p6 = scmp.lt.s32.totalorder %s3964_s13, %s3964_s13 }
  0x4e   :  { %v3294_v10 = vcombine.high %v99_v6, %v103_v7  ;;  %v107_v13 = vld [vmem:[#allocation5 + $0x80] sm:$0xff]  ;;  %2071 = vmatprep.subr.bf16.mxu0 %v3286_v3  ;;  %v3296_v14 = vcombine.high %v100_v11, %v104_v12  ;;  %v108_v16 = vld [vmem:[#allocation5 + $0x88] sm:$0xff]  ;;  %2194 = vmatprep.subr.bf16.mxu1 %v3288_v8  ;;  %v3293_v18 = vcombine.low %v99_v6, %v103_v7 }
  0x4f   :  { %v111_v15 = vld [vmem:[#allocation5 + $0xa0] sm:$0xff]  ;;  %v112_v17 = vld [vmem:[#allocation5 + $0xa8] sm:$0xff]  ;;  %2072 = vmatpush1.bf16.msra.mxu0 %v3285_v5  ;;  %2195 = vmatpush1.bf16.msra.mxu1 %v3287_v9  ;;  %v3295_v19 = vcombine.low %v100_v11, %v104_v12  ;;  %p3971_p7 = por %p3970_p6, %p3969_p5 }
  0x50   :  { %2073 = vmatprep.subr.bf16.mxu0 %v3294_v10  ;;  %v3302_v20 = vcombine.high %v107_v13, %v111_v15  ;;  %2196 = vmatprep.subr.bf16.mxu1 %v3296_v14  ;;  %v3304_v21 = vcombine.high %v108_v16, %v112_v17  ;;  %v115_v22 = vld [vmem:[#allocation5 + $0xc0] sm:$0xff]  ;;  %v116_v24 = vld [vmem:[#allocation5 + $0xc8] sm:$0xff]  ;;  %v3301_v26 = vcombine.low %v107_v13, %v111_v15 }
  0x51   :  { %v119_v23 = vld [vmem:[#allocation5 + $0xe0] sm:$0xff]  ;;  %v120_v25 = vld [vmem:[#allocation5 + $0xe8] sm:$0xff]  ;;  %v3303_v27 = vcombine.low %v108_v16, %v112_v17  ;;  %p3972_p8 = pnand %p3971_p7, %p3965_p4 }
  0x52   :  { %v3310_v28 = vcombine.high %v115_v22, %v119_v23  ;;  %v3312_v29 = vcombine.high %v116_v24, %v120_v25  ;;  %v123_v30 = vld [vmem:[#allocation5 + $0x100] sm:$0xff]  ;;  %v124_v32 = vld [vmem:[#allocation5 + $0x108] sm:$0xff]  ;;  %v3309_v34 = vcombine.low %v115_v22, %v119_v23  ;;  %v3311_v35 = vcombine.low %v116_v24, %v120_v25 }
  0x53   :  { %2074 = vmatpush1.bf16.msra.mxu0 %v3293_v18  ;;  %2197 = vmatpush1.bf16.msra.mxu1 %v3295_v19  ;;  %v127_v31 = vld [vmem:[#allocation5 + $0x120] sm:$0xff]  ;;  %v128_v33 = vld [vmem:[#allocation5 + $0x128] sm:$0xff] }
  0x54   :  { %2075 = vmatprep.subr.bf16.mxu0 %v3302_v20  ;;  %2198 = vmatprep.subr.bf16.mxu1 %v3304_v21  ;;  %v3318_v36 = vcombine.high %v123_v30, %v127_v31  ;;  %v3320_v37 = vcombine.high %v124_v32, %v128_v33  ;;  %v131_v38 = vld [vmem:[#allocation5 + $0x140] sm:$0xff]  ;;  %v132_v40 = vld [vmem:[#allocation5 + $0x148] sm:$0xff]  ;;  %v3317_v42 = vcombine.low %v123_v30, %v127_v31 }
  0x55   :  { %v135_v39 = vld [vmem:[#allocation5 + $0x160] sm:$0xff]  ;;  %v136_v41 = vld [vmem:[#allocation5 + $0x168] sm:$0xff]  ;;  %v3319_v43 = vcombine.low %v124_v32, %v128_v33 }
  0x56   :  { %v3326_v44 = vcombine.high %v131_v38, %v135_v39  ;;  %v3328_v45 = vcombine.high %v132_v40, %v136_v41  ;;  %v139_v46 = vld [vmem:[#allocation5 + $0x180] sm:$0xff]  ;;  %v140_v48 = vld [vmem:[#allocation5 + $0x188] sm:$0xff]  ;;  %v3325_v50 = vcombine.low %v131_v38, %v135_v39  ;;  %v3327_v51 = vcombine.low %v132_v40, %v136_v41 }
  0x57   :  { %2076 = vmatpush1.bf16.msra.mxu0 %v3301_v26  ;;  %2199 = vmatpush1.bf16.msra.mxu1 %v3303_v27  ;;  %v143_v47 = vld [vmem:[#allocation5 + $0x1a0] sm:$0xff]  ;;  %v144_v49 = vld [vmem:[#allocation5 + $0x1a8] sm:$0xff] }
  0x58   :  { %2077 = vmatprep.subr.bf16.mxu0 %v3310_v28  ;;  %2200 = vmatprep.subr.bf16.mxu1 %v3312_v29  ;;  %v3334_v52 = vcombine.high %v139_v46, %v143_v47  ;;  %v4077_v53 = vld [vmem:[#allocation2] sm:$0xff]  ;;  %v3336_v54 = vcombine.high %v140_v48, %v144_v49  ;;  %v147_v55 = vld [vmem:[#allocation5 + $0x1c0] sm:$0xff]  ;;  %v3333_v60 = vcombine.low %v139_v46, %v143_v47 }
  0x59   :  { %v151_v56 = vld [vmem:[#allocation5 + $0x1e0] sm:$0xff]  ;;  %v4081_v57 = vcombine.high %v4077_v53, %v4077_v53  ;;  %v148_v58 = vld [vmem:[#allocation5 + $0x1c8] sm:$0xff]  ;;  %v3335_v61 = vcombine.low %v140_v48, %v144_v49 }
  0x5a   :  { %v152_v59 = vld [vmem:[#allocation5 + $0x1e8] sm:$0xff]  ;;  %v3342_v62 = vcombine.high %v147_v55, %v151_v56  ;;  %v155_v0 = vld [vmem:[#allocation5 + $0x200] sm:$0xff]  ;;  %v3341_v4 = vcombine.low %v147_v55, %v151_v56 }
  0x5b   :  { %2078 = vmatpush1.bf16.msra.mxu0 %v3309_v34  ;;  %2201 = vmatpush1.bf16.msra.mxu1 %v3311_v35  ;;  %v3344_v63 = vcombine.high %v148_v58, %v152_v59  ;;  %v159_v1 = vld [vmem:[#allocation5 + $0x220] sm:$0xff]  ;;  %v156_v2 = vld [vmem:[#allocation5 + $0x208] sm:$0xff]  ;;  %v3343_v5 = vcombine.low %v148_v58, %v152_v59 }
  0x5c   :  { %2079 = vmatprep.subr.bf16.mxu0 %v3318_v36  ;;  %2202 = vmatprep.subr.bf16.mxu1 %v3320_v37  ;;  %v160_v3 = vld [vmem:[#allocation5 + $0x228] sm:$0xff]  ;;  %v3350_v6 = vcombine.high %v155_v0, %v159_v1  ;;  %v163_v8 = vld [vmem:[#allocation5 + $0x240] sm:$0xff]  ;;  %v3349_v12 = vcombine.low %v155_v0, %v159_v1 }
  0x5d   :  { %2103 = vmatprep.mubr.bf16.mxu0 %v4081_v57  ;;  %2226 = vmatprep.mubr.bf16.mxu1 %v4081_v57  ;;  %v3352_v7 = vcombine.high %v156_v2, %v160_v3  ;;  %v167_v9 = vld [vmem:[#allocation5 + $0x260] sm:$0xff]  ;;  %v164_v10 = vld [vmem:[#allocation5 + $0x248] sm:$0xff]  ;;  %v3351_v13 = vcombine.low %v156_v2, %v160_v3 }
  0x5e   :  { %v168_v11 = vld [vmem:[#allocation5 + $0x268] sm:$0xff]  ;;  %v3358_v14 = vcombine.high %v163_v8, %v167_v9  ;;  %v171_v16 = vld [vmem:[#allocation5 + $0x280] sm:$0xff]  ;;  %v3357_v20 = vcombine.low %v163_v8, %v167_v9 }
  0x5f   :  { %2080 = vmatpush1.bf16.msra.mxu0 %v3317_v42  ;;  %2203 = vmatpush1.bf16.msra.mxu1 %v3319_v43  ;;  %v3360_v15 = vcombine.high %v164_v10, %v168_v11  ;;  %v175_v17 = vld [vmem:[#allocation5 + $0x2a0] sm:$0xff]  ;;  %v172_v18 = vld [vmem:[#allocation5 + $0x288] sm:$0xff]  ;;  %v3359_v21 = vcombine.low %v164_v10, %v168_v11 }
  0x60   :  { %2081 = vmatprep.subr.bf16.mxu0 %v3326_v44  ;;  %2204 = vmatprep.subr.bf16.mxu1 %v3328_v45  ;;  %v176_v19 = vld [vmem:[#allocation5 + $0x2a8] sm:$0xff]  ;;  %v3366_v22 = vcombine.high %v171_v16, %v175_v17  ;;  %v179_v24 = vld [vmem:[#allocation5 + $0x2c0] sm:$0xff]  ;;  %v3365_v28 = vcombine.low %v171_v16, %v175_v17 }
  0x61   :  { %v3368_v23 = vcombine.high %v172_v18, %v176_v19  ;;  %v183_v25 = vld [vmem:[#allocation5 + $0x2e0] sm:$0xff]  ;;  %v180_v26 = vld [vmem:[#allocation5 + $0x2c8] sm:$0xff]  ;;  %v3367_v29 = vcombine.low %v172_v18, %v176_v19 }
  0x62   :  { %v184_v27 = vld [vmem:[#allocation5 + $0x2e8] sm:$0xff]  ;;  %v3374_v30 = vcombine.high %v179_v24, %v183_v25  ;;  %v187_v32 = vld [vmem:[#allocation5 + $0x300] sm:$0xff]  ;;  %v3373_v36 = vcombine.low %v179_v24, %v183_v25 }
  0x63   :  { %2082 = vmatpush1.bf16.msra.mxu0 %v3325_v50  ;;  %2205 = vmatpush1.bf16.msra.mxu1 %v3327_v51  ;;  %v3376_v31 = vcombine.high %v180_v26, %v184_v27  ;;  %v191_v33 = vld [vmem:[#allocation5 + $0x320] sm:$0xff]  ;;  %v188_v34 = vld [vmem:[#allocation5 + $0x308] sm:$0xff]  ;;  %v3375_v37 = vcombine.low %v180_v26, %v184_v27 }
  0x64   :  { %2083 = vmatprep.subr.bf16.mxu0 %v3334_v52  ;;  %2206 = vmatprep.subr.bf16.mxu1 %v3336_v54  ;;  %v192_v35 = vld [vmem:[#allocation5 + $0x328] sm:$0xff]  ;;  %v3382_v38 = vcombine.high %v187_v32, %v191_v33  ;;  %v195_v40 = vld [vmem:[#allocation5 + $0x340] sm:$0xff]  ;;  %v3381_v44 = vcombine.low %v187_v32, %v191_v33 }
  0x65   :  { %v3384_v39 = vcombine.high %v188_v34, %v192_v35  ;;  %v199_v41 = vld [vmem:[#allocation5 + $0x360] sm:$0xff]  ;;  %v196_v42 = vld [vmem:[#allocation5 + $0x348] sm:$0xff]  ;;  %v3383_v45 = vcombine.low %v188_v34, %v192_v35 }
  0x66   :  { %v200_v43 = vld [vmem:[#allocation5 + $0x368] sm:$0xff]  ;;  %v3390_v46 = vcombine.high %v195_v40, %v199_v41  ;;  %v203_v48 = vld [vmem:[#allocation5 + $0x380] sm:$0xff]  ;;  %v3389_v52 = vcombine.low %v195_v40, %v199_v41 }
  0x67   :  { %2084 = vmatpush1.bf16.msra.mxu0 %v3333_v60  ;;  %2207 = vmatpush1.bf16.msra.mxu1 %v3335_v61  ;;  %v3392_v47 = vcombine.high %v196_v42, %v200_v43  ;;  %v207_v49 = vld [vmem:[#allocation5 + $0x3a0] sm:$0xff]  ;;  %v204_v50 = vld [vmem:[#allocation5 + $0x388] sm:$0xff]  ;;  %v3391_v54 = vcombine.low %v196_v42, %v200_v43 }
  0x68   :  { %2085 = vmatprep.subr.bf16.mxu0 %v3342_v62  ;;  %2208 = vmatprep.subr.bf16.mxu1 %v3344_v63  ;;  %v208_v51 = vld [vmem:[#allocation5 + $0x3a8] sm:$0xff]  ;;  %v3398_v55 = vcombine.high %v203_v48, %v207_v49  ;;  %v211_v58 = vld [vmem:[#allocation5 + $0x3c0] sm:$0xff]  ;;  %v3397_v62 = vcombine.low %v203_v48, %v207_v49 }
  0x69   :  { %v3400_v56 = vcombine.high %v204_v50, %v208_v51  ;;  %v215_v59 = vld [vmem:[#allocation5 + $0x3e0] sm:$0xff]  ;;  %v212_v60 = vld [vmem:[#allocation5 + $0x3c8] sm:$0xff]  ;;  %v3399_v63 = vcombine.low %v204_v50, %v208_v51 }
  0x6a   :  { %v216_v61 = vld [vmem:[#allocation5 + $0x3e8] sm:$0xff]  ;;  %v3406_v0 = vcombine.high %v211_v58, %v215_v59  ;;  %v219_v2 = vld [vmem:[#allocation5 + $0x400] sm:$0xff] }
  0x6b   :  { %2086 = vmatpush1.bf16.msra.mxu0 %v3341_v4  ;;  %2209 = vmatpush1.bf16.msra.mxu1 %v3343_v5  ;;  %v3408_v1 = vcombine.high %v212_v60, %v216_v61  ;;  %v223_v3 = vld [vmem:[#allocation5 + $0x420] sm:$0xff]  ;;  %v220_v4 = vld [vmem:[#allocation5 + $0x408] sm:$0xff] }
  0x6c   :  { %2087 = vmatprep.subr.bf16.mxu0 %v3350_v6  ;;  %2210 = vmatprep.subr.bf16.mxu1 %v3352_v7  ;;  %v224_v5 = vld [vmem:[#allocation5 + $0x428] sm:$0xff]  ;;  %v3405_v6 = vcombine.low %v211_v58, %v215_v59  ;;  %v3407_v7 = vcombine.low %v212_v60, %v216_v61  ;;  %v3414_v8 = vcombine.high %v219_v2, %v223_v3  ;;  %v227_v10 = vld [vmem:[#allocation5 + $0x440] sm:$0xff] }
  0x6d   :  { %v3416_v9 = vcombine.high %v220_v4, %v224_v5  ;;  %v231_v11 = vld [vmem:[#allocation5 + $0x460] sm:$0xff]  ;;  %v3413_v16 = vcombine.low %v219_v2, %v223_v3  ;;  %v3415_v17 = vcombine.low %v220_v4, %v224_v5 }
  0x6e   :  { %v3422_v18 = vcombine.high %v227_v10, %v231_v11  ;;  %v235_v19 = vld [vmem:[#allocation5 + $0x480] sm:$0xff]  ;;  %v3421_v24 = vcombine.low %v227_v10, %v231_v11 }
  0x6f   :  { %2088 = vmatpush1.bf16.msra.mxu0 %v3349_v12  ;;  %2211 = vmatpush1.bf16.msra.mxu1 %v3351_v13  ;;  %v4087_v12 = vcombine.low %v4077_v53, %v4077_v53  ;;  %v228_v13 = vld [vmem:[#allocation5 + $0x448] sm:$0xff]  ;;  %v243_v27 = vld [vmem:[#allocation5 + $0x4c0] sm:$0xff] }
  0x70   :  { %2089 = vmatprep.subr.bf16.mxu0 %v3358_v14  ;;  %2212 = vmatprep.subr.bf16.mxu1 %v3360_v15  ;;  %v232_v14 = vld [vmem:[#allocation5 + $0x468] sm:$0xff]  ;;  %v4089_v15 = vld [vmem:[#allocation2 + $0x8] sm:$0xff]  ;;  %v251_v35 = vld [vmem:[#allocation5 + $0x500] sm:$0xff] }
  0x71   :  { %v4093_v53 = vcombine.high %v4089_v15, %v4089_v15  ;;  %v3423_v25 = vcombine.low %v228_v13, %v232_v14  ;;  %v259_v43 = vld [vmem:[#allocation5 + $0x540] sm:$0xff] }
  0x72   :  { %v267_v51 = vld [vmem:[#allocation5 + $0x580] sm:$0xff] }
  0x73   :  { %2090 = vmatpush1.bf16.msra.mxu0 %v3357_v20  ;;  %2213 = vmatpush1.bf16.msra.mxu1 %v3359_v21  ;;  %v239_v20 = vld [vmem:[#allocation5 + $0x4a0] sm:$0xff]  ;;  %v3424_v21 = vcombine.high %v228_v13, %v232_v14 }
  0x74   :  { %2091 = vmatprep.subr.bf16.mxu0 %v3366_v22  ;;  %2214 = vmatprep.subr.bf16.mxu1 %v3368_v23  ;;  %v236_v22 = vld [vmem:[#allocation5 + $0x488] sm:$0xff]  ;;  %v3430_v26 = vcombine.high %v235_v19, %v239_v20  ;;  %v3429_v32 = vcombine.low %v235_v19, %v239_v20  ;;  %v275_v61 = vld [vmem:[#allocation5 + $0x5c0] sm:$0xff] }
  0x75   :  { %v240_v23 = vld [vmem:[#allocation5 + $0x4a8] sm:$0xff]  ;;  %v283_v5 = vld [vmem:[#allocation5 + $0x600] sm:$0xff] }
  0x76   :  { %v3431_v33 = vcombine.low %v236_v22, %v240_v23  ;;  %v291_v14 = vld [vmem:[#allocation5 + $0x640] sm:$0xff]  ;;  %v296_v19 = vld [vmem:[#allocation5 + $0x668] sm:$0xff] }
  0x77   :  { %2092 = vmatpush1.bf16.msra.mxu0 %v3365_v28  ;;  %2215 = vmatpush1.bf16.msra.mxu1 %v3367_v29  ;;  %v247_v28 = vld [vmem:[#allocation5 + $0x4e0] sm:$0xff]  ;;  %v244_v29 = vld [vmem:[#allocation5 + $0x4c8] sm:$0xff] }
  0x78   :  { %2093 = vmatprep.subr.bf16.mxu0 %v3374_v30  ;;  %2216 = vmatprep.subr.bf16.mxu1 %v3376_v31  ;;  %v3432_v30 = vcombine.high %v236_v22, %v240_v23  ;;  %v248_v31 = vld [vmem:[#allocation5 + $0x4e8] sm:$0xff]  ;;  %v3438_v34 = vcombine.high %v243_v27, %v247_v28  ;;  %v3437_v40 = vcombine.low %v243_v27, %v247_v28  ;;  %v299_v23 = vld [vmem:[#allocation5 + $0x680] sm:$0xff] }
  0x79   :  { %v3439_v41 = vcombine.low %v244_v29, %v248_v31  ;;  %v304_v27 = vld [vmem:[#allocation5 + $0x6a8] sm:$0xff] }
  0x7b   :  { %2094 = vmatpush1.bf16.msra.mxu0 %v3373_v36  ;;  %2217 = vmatpush1.bf16.msra.mxu1 %v3375_v37  ;;  %v255_v36 = vld [vmem:[#allocation5 + $0x520] sm:$0xff]  ;;  %v252_v37 = vld [vmem:[#allocation5 + $0x508] sm:$0xff] }
  0x7c   :  { %2095 = vmatprep.subr.bf16.mxu0 %v3382_v38  ;;  %2218 = vmatprep.subr.bf16.mxu1 %v3384_v39  ;;  %v3440_v38 = vcombine.high %v244_v29, %v248_v31  ;;  %v256_v39 = vld [vmem:[#allocation5 + $0x528] sm:$0xff]  ;;  %v3446_v42 = vcombine.high %v251_v35, %v255_v36  ;;  %v3445_v48 = vcombine.low %v251_v35, %v255_v36  ;;  %v307_v31 = vld [vmem:[#allocation5 + $0x6c0] sm:$0xff] }
  0x7d   :  { %v3447_v49 = vcombine.low %v252_v37, %v256_v39  ;;  %v312_v35 = vld [vmem:[#allocation5 + $0x6e8] sm:$0xff] }
  0x7f   :  { %2096 = vmatpush1.bf16.msra.mxu0 %v3381_v44  ;;  %2219 = vmatpush1.bf16.msra.mxu1 %v3383_v45  ;;  %v263_v44 = vld [vmem:[#allocation5 + $0x560] sm:$0xff]  ;;  %v260_v45 = vld [vmem:[#allocation5 + $0x548] sm:$0xff] }
  0x80   :  { %2097 = vmatprep.subr.bf16.mxu0 %v3390_v46  ;;  %2220 = vmatprep.subr.bf16.mxu1 %v3392_v47  ;;  %v3448_v46 = vcombine.high %v252_v37, %v256_v39  ;;  %v264_v47 = vld [vmem:[#allocation5 + $0x568] sm:$0xff]  ;;  %v3454_v50 = vcombine.high %v259_v43, %v263_v44  ;;  %v3453_v58 = vcombine.low %v259_v43, %v263_v44  ;;  %v315_v39 = vld [vmem:[#allocation5 + $0x700] sm:$0xff] }
  0x81   :  { %v3455_v59 = vcombine.low %v260_v45, %v264_v47  ;;  %v320_v43 = vld [vmem:[#allocation5 + $0x728] sm:$0xff] }
  0x83   :  { %2098 = vmatpush1.bf16.msra.mxu0 %v3389_v52  ;;  %2221 = vmatpush1.bf16.msra.mxu1 %v3391_v54  ;;  %v271_v52 = vld [vmem:[#allocation5 + $0x5a0] sm:$0xff]  ;;  %v268_v54 = vld [vmem:[#allocation5 + $0x588] sm:$0xff] }
  0x84   :  { %2099 = vmatprep.subr.bf16.mxu0 %v3398_v55  ;;  %2222 = vmatprep.subr.bf16.mxu1 %v3400_v56  ;;  %v3456_v55 = vcombine.high %v260_v45, %v264_v47  ;;  %v272_v56 = vld [vmem:[#allocation5 + $0x5a8] sm:$0xff]  ;;  %v3462_v60 = vcombine.high %v267_v51, %v271_v52  ;;  %v3461_v2 = vcombine.low %v267_v51, %v271_v52  ;;  %v323_v47 = vld [vmem:[#allocation5 + $0x740] sm:$0xff] }
  0x85   :  { %v3463_v3 = vcombine.low %v268_v54, %v272_v56  ;;  %v328_v51 = vld [vmem:[#allocation5 + $0x768] sm:$0xff] }
  0x87   :  { %2100 = vmatpush1.bf16.msra.mxu0 %v3397_v62  ;;  %2223 = vmatpush1.bf16.msra.mxu1 %v3399_v63  ;;  %v279_v62 = vld [vmem:[#allocation5 + $0x5e0] sm:$0xff]  ;;  %v276_v63 = vld [vmem:[#allocation5 + $0x5c8] sm:$0xff] }
  0x88   :  { %2101 = vmatprep.subr.bf16.mxu0 %v3406_v0  ;;  %2224 = vmatprep.subr.bf16.mxu1 %v3408_v1  ;;  %v3464_v0 = vcombine.high %v268_v54, %v272_v56  ;;  %v280_v1 = vld [vmem:[#allocation5 + $0x5e8] sm:$0xff]  ;;  %v3470_v4 = vcombine.high %v275_v61, %v279_v62  ;;  %v3469_v10 = vcombine.low %v275_v61, %v279_v62  ;;  %v331_v56 = vld [vmem:[#allocation5 + $0x780] sm:$0xff] }
  0x89   :  { %v3471_v11 = vcombine.low %v276_v63, %v280_v1  ;;  %v336_v61 = vld [vmem:[#allocation5 + $0x7a8] sm:$0xff] }
  0x8b   :  { %2102 = vmatpush1.bf16.msra.mxu0 %v3405_v6  ;;  %2225 = vmatpush1.bf16.msra.mxu1 %v3407_v7  ;;  %v287_v6 = vld [vmem:[#allocation5 + $0x620] sm:$0xff]  ;;  %v284_v7 = vld [vmem:[#allocation5 + $0x608] sm:$0xff] }
  0x8c   :  { %2112 = vmatprep.subr.bf16.mxu0 %v3414_v8  ;;  %2235 = vmatprep.subr.bf16.mxu1 %v3416_v9  ;;  %v3472_v8 = vcombine.high %v276_v63, %v280_v1  ;;  %v288_v9 = vld [vmem:[#allocation5 + $0x628] sm:$0xff]  ;;  %v3478_v13 = vcombine.high %v283_v5, %v287_v6  ;;  %v3477_v20 = vcombine.low %v283_v5, %v287_v6  ;;  %v339_v1 = vld [vmem:[#allocation5 + $0x7c0] sm:$0xff] }
  0x8d   :  { %v344_v5 = vld [vmem:[#allocation5 + $0x7e8] sm:$0xff] }
  0x8e   :  { %2104 = vmatmul.mubr.bf16.vlgmr.msra.gmra.mrb[0].mxu0 %v4087_v12  ;;  %2227 = vmatmul.mubr.bf16.vlgmr.msra.gmra.mrb[0].mxu1 %v4087_v12 }
  0x8f   :  { %2113 = vmatpush1.bf16.msra.mxu0 %v3413_v16  ;;  %2236 = vmatpush1.bf16.msra.mxu1 %v3415_v17  ;;  %v295_v16 = vld [vmem:[#allocation5 + $0x660] sm:$0xff]  ;;  %v292_v17 = vld [vmem:[#allocation5 + $0x648] sm:$0xff] }
  0x90   :  { %2114 = vmatprep.subr.bf16.mxu0 %v3422_v18  ;;  %2237 = vmatprep.subr.bf16.mxu1 %v3424_v21  ;;  %v3480_v18 = vcombine.high %v284_v7, %v288_v9  ;;  %v3479_v21 = vcombine.low %v284_v7, %v288_v9  ;;  %v3486_v22 = vcombine.high %v291_v14, %v295_v16  ;;  %v347_v9 = vld [vmem:[#allocation5 + $0x800] sm:$0xff] }
  0x91   :  { %2144 = vmatprep.mubr.bf16.mxu0 %v4093_v53  ;;  %2267 = vmatprep.mubr.bf16.mxu1 %v4093_v53  ;;  %v3485_v28 = vcombine.low %v291_v14, %v295_v16  ;;  %v3487_v29 = vcombine.low %v292_v17, %v296_v19  ;;  %v352_v14 = vld [vmem:[#allocation5 + $0x828] sm:$0xff] }
  0x93   :  { %2115 = vmatpush1.bf16.msra.mxu0 %v3421_v24  ;;  %2238 = vmatpush1.bf16.msra.mxu1 %v3423_v25  ;;  %v303_v24 = vld [vmem:[#allocation5 + $0x6a0] sm:$0xff]  ;;  %v300_v25 = vld [vmem:[#allocation5 + $0x688] sm:$0xff] }
  0x94   :  { %2116 = vmatprep.subr.bf16.mxu0 %v3430_v26  ;;  %2239 = vmatprep.subr.bf16.mxu1 %v3432_v30  ;;  %v3488_v26 = vcombine.high %v292_v17, %v296_v19  ;;  %v3494_v30 = vcombine.high %v299_v23, %v303_v24  ;;  %v3493_v36 = vcombine.low %v299_v23, %v303_v24  ;;  %v355_v19 = vld [vmem:[#allocation5 + $0x840] sm:$0xff]  ;;  %v360_v23 = vld [vmem:[#allocation5 + $0x868] sm:$0xff] }
  0x95   :  { %v3495_v37 = vcombine.low %v300_v25, %v304_v27  ;;  %v4101_v24 = vcombine.low %v4089_v15, %v4089_v15 }
  0x97   :  { %2117 = vmatpush1.bf16.msra.mxu0 %v3429_v32  ;;  %2240 = vmatpush1.bf16.msra.mxu1 %v3431_v33  ;;  %v311_v32 = vld [vmem:[#allocation5 + $0x6e0] sm:$0xff]  ;;  %v308_v33 = vld [vmem:[#allocation5 + $0x6c8] sm:$0xff] }
  0x98   :  { %2118 = vmatprep.subr.bf16.mxu0 %v3438_v34  ;;  %2241 = vmatprep.subr.bf16.mxu1 %v3440_v38  ;;  %v3496_v34 = vcombine.high %v300_v25, %v304_v27  ;;  %v3502_v38 = vcombine.high %v307_v31, %v311_v32  ;;  %v3501_v44 = vcombine.low %v307_v31, %v311_v32  ;;  %v364_v31 = vld [vmem:[#allocation5 + $0x888] sm:$0xff] }
  0x99   :  { %v3503_v45 = vcombine.low %v308_v33, %v312_v35  ;;  %v368_v32 = vld [vmem:[#allocation5 + $0x8a8] sm:$0xff] }
  0x9b   :  { %2119 = vmatpush1.bf16.msra.mxu0 %v3437_v40  ;;  %2242 = vmatpush1.bf16.msra.mxu1 %v3439_v41  ;;  %v319_v40 = vld [vmem:[#allocation5 + $0x720] sm:$0xff]  ;;  %v316_v41 = vld [vmem:[#allocation5 + $0x708] sm:$0xff] }
  0x9c   :  { %2120 = vmatprep.subr.bf16.mxu0 %v3446_v42  ;;  %2243 = vmatprep.subr.bf16.mxu1 %v3448_v46  ;;  %v3504_v42 = vcombine.high %v308_v33, %v312_v35  ;;  %v3510_v46 = vcombine.high %v315_v39, %v319_v40  ;;  %v3509_v52 = vcombine.low %v315_v39, %v319_v40  ;;  %v372_v39 = vld [vmem:[#allocation5 + $0x8c8] sm:$0xff] }
  0x9d   :  { %v3511_v54 = vcombine.low %v316_v41, %v320_v43  ;;  %v3560_v35 = vcombine.high %v364_v31, %v368_v32  ;;  %v376_v40 = vld [vmem:[#allocation5 + $0x8e8] sm:$0xff] }
  0x9f   :  { %2121 = vmatpush1.bf16.msra.mxu0 %v3445_v48  ;;  %2244 = vmatpush1.bf16.msra.mxu1 %v3447_v49  ;;  %v327_v48 = vld [vmem:[#allocation5 + $0x760] sm:$0xff]  ;;  %v324_v49 = vld [vmem:[#allocation5 + $0x748] sm:$0xff] }
  0xa0   :  { %2122 = vmatprep.subr.bf16.mxu0 %v3454_v50  ;;  %2245 = vmatprep.subr.bf16.mxu1 %v3456_v55  ;;  %v3512_v50 = vcombine.high %v316_v41, %v320_v43  ;;  %v3518_v55 = vcombine.high %v323_v47, %v327_v48  ;;  %v3517_v62 = vcombine.low %v323_v47, %v327_v48  ;;  %v380_v47 = vld [vmem:[#allocation5 + $0x908] sm:$0xff] }
  0xa1   :  { %v3519_v63 = vcombine.low %v324_v49, %v328_v51  ;;  %v384_v48 = vld [vmem:[#allocation5 + $0x928] sm:$0xff] }
  0xa3   :  { %2123 = vmatpush1.bf16.msra.mxu0 %v3453_v58  ;;  %2246 = vmatpush1.bf16.msra.mxu1 %v3455_v59  ;;  %v335_v58 = vld [vmem:[#allocation5 + $0x7a0] sm:$0xff]  ;;  %v332_v59 = vld [vmem:[#allocation5 + $0x788] sm:$0xff] }
  0xa4   :  { %2124 = vmatprep.subr.bf16.mxu0 %v3462_v60  ;;  %2247 = vmatprep.subr.bf16.mxu1 %v3464_v0  ;;  %v3520_v60 = vcombine.high %v324_v49, %v328_v51  ;;  %v3526_v0 = vcombine.high %v331_v56, %v335_v58  ;;  %v3525_v6 = vcombine.low %v331_v56, %v335_v58  ;;  %v388_v56 = vld [vmem:[#allocation5 + $0x948] sm:$0xff] }
  0xa5   :  { %v3527_v7 = vcombine.low %v332_v59, %v336_v61  ;;  %v392_v58 = vld [vmem:[#allocation5 + $0x968] sm:$0xff] }
  0xa7   :  { %2125 = vmatpush1.bf16.msra.mxu0 %v3461_v2  ;;  %2248 = vmatpush1.bf16.msra.mxu1 %v3463_v3  ;;  %v343_v2 = vld [vmem:[#allocation5 + $0x7e0] sm:$0xff]  ;;  %v340_v3 = vld [vmem:[#allocation5 + $0x7c8] sm:$0xff] }
  0xa8   :  { %2126 = vmatprep.subr.bf16.mxu0 %v3470_v4  ;;  %2249 = vmatprep.subr.bf16.mxu1 %v3472_v8  ;;  %v3528_v4 = vcombine.high %v332_v59, %v336_v61  ;;  %v3534_v8 = vcombine.high %v339_v1, %v343_v2  ;;  %v3533_v16 = vcombine.low %v339_v1, %v343_v2  ;;  %v396_v1 = vld [vmem:[#allocation5 + $0x988] sm:$0xff] }
  0xa9   :  { %v3535_v17 = vcombine.low %v340_v3, %v344_v5  ;;  %v400_v2 = vld [vmem:[#allocation5 + $0x9a8] sm:$0xff] }
  0xab   :  { %2127 = vmatpush1.bf16.msra.mxu0 %v3469_v10  ;;  %2250 = vmatpush1.bf16.msra.mxu1 %v3471_v11  ;;  %v351_v10 = vld [vmem:[#allocation5 + $0x820] sm:$0xff]  ;;  %v348_v11 = vld [vmem:[#allocation5 + $0x808] sm:$0xff] }
  0xac   :  { %2128 = vmatprep.subr.bf16.mxu0 %v3478_v13  ;;  %2251 = vmatprep.subr.bf16.mxu1 %v3480_v18  ;;  %v3536_v13 = vcombine.high %v340_v3, %v344_v5  ;;  %v3542_v18 = vcombine.high %v347_v9, %v351_v10  ;;  %v3541_v25 = vcombine.low %v347_v9, %v351_v10  ;;  %v404_v9 = vld [vmem:[#allocation5 + $0x9c8] sm:$0xff] }
  0xad   :  { %v408_v10 = vld [vmem:[#allocation5 + $0x9e8] sm:$0xff] }
  0xaf   :  { %2129 = vmatpush1.bf16.msra.mxu0 %v3477_v20  ;;  %2252 = vmatpush1.bf16.msra.mxu1 %v3479_v21  ;;  %v359_v20 = vld [vmem:[#allocation5 + $0x860] sm:$0xff]  ;;  %v356_v21 = vld [vmem:[#allocation5 + $0x848] sm:$0xff] }
  0xb0   :  { %2130 = vmatprep.subr.bf16.mxu0 %v3486_v22  ;;  %2253 = vmatprep.subr.bf16.mxu1 %v3488_v26  ;;  %v3544_v22 = vcombine.high %v348_v11, %v352_v14  ;;  %v3543_v26 = vcombine.low %v348_v11, %v352_v14  ;;  %v3550_v27 = vcombine.high %v355_v19, %v359_v20 }
  0xb1   :  { %v3549_v33 = vcombine.low %v355_v19, %v359_v20  ;;  %v3551_v15 = vcombine.low %v356_v21, %v360_v23  ;;  %v94_v19 = vld [vmem:[#allocation5 + $0x18] sm:$0xff] }
  0xb2   :  { %v98_v20 = vld [vmem:[#allocation5 + $0x38] sm:$0xff] }
  0xb3   :  { %2131 = vmatpush1.bf16.msra.mxu0 %v3485_v28  ;;  %2254 = vmatpush1.bf16.msra.mxu1 %v3487_v29  ;;  %v3552_v28 = vcombine.high %v356_v21, %v360_v23  ;;  %v363_v29 = vld [vmem:[#allocation5 + $0x880] sm:$0xff] }
  0xb4   :  { %2132 = vmatprep.subr.bf16.mxu0 %v3494_v30  ;;  %2255 = vmatprep.subr.bf16.mxu1 %v3496_v34  ;;  %v367_v30 = vld [vmem:[#allocation5 + $0x8a0] sm:$0xff] }
  0xb5   :  { %v3558_v34 = vcombine.high %v363_v29, %v367_v30  ;;  %v3557_v41 = vcombine.low %v363_v29, %v367_v30  ;;  %v102_v29 = vld [vmem:[#allocation5 + $0x58] sm:$0xff] }
  0xb6   :  { %v106_v30 = vld [vmem:[#allocation5 + $0x78] sm:$0xff] }
  0xb7   :  { %2133 = vmatpush1.bf16.msra.mxu0 %v3493_v36  ;;  %2256 = vmatpush1.bf16.msra.mxu1 %v3495_v37  ;;  %v371_v36 = vld [vmem:[#allocation5 + $0x8c0] sm:$0xff] }
  0xb8   :  { %2134 = vmatprep.subr.bf16.mxu0 %v3502_v38  ;;  %2257 = vmatprep.subr.bf16.mxu1 %v3504_v42  ;;  %v375_v37 = vld [vmem:[#allocation5 + $0x8e0] sm:$0xff]  ;;  %v4002_v38 = vmov 0   ;;  %v3559_v42 = vcombine.low %v364_v31, %v368_v32  ;;  %v3291_v32 = vcombine.low %v94_v19, %v98_v20 }
  0xb9   :  { %v3566_v43 = vcombine.high %v371_v36, %v375_v37  ;;  %v3565_v49 = vcombine.low %v371_v36, %v375_v37  ;;  %v110_v36 = vld [vmem:[#allocation5 + $0x98] sm:$0xff] }
  0xba   :  { %v114_v37 = vld [vmem:[#allocation5 + $0xb8] sm:$0xff] }
  0xbb   :  { %2135 = vmatpush1.bf16.msra.mxu0 %v3501_v44  ;;  %2258 = vmatpush1.bf16.msra.mxu1 %v3503_v45  ;;  %v3568_v44 = vcombine.high %v372_v39, %v376_v40  ;;  %v379_v45 = vld [vmem:[#allocation5 + $0x900] sm:$0xff] }
  0xbc   :  { %2136 = vmatprep.subr.bf16.mxu0 %v3510_v46  ;;  %2259 = vmatprep.subr.bf16.mxu1 %v3512_v50  ;;  %v383_v46 = vld [vmem:[#allocation5 + $0x920] sm:$0xff]  ;;  %v3567_v50 = vcombine.low %v372_v39, %v376_v40  ;;  %v3299_v40 = vcombine.low %v102_v29, %v106_v30 }
  0xbd   :  { %v3574_v51 = vcombine.high %v379_v45, %v383_v46  ;;  %v3573_v59 = vcombine.low %v379_v45, %v383_v46  ;;  %v118_v45 = vld [vmem:[#allocation5 + $0xd8] sm:$0xff] }
  0xbe   :  { %v122_v46 = vld [vmem:[#allocation5 + $0xf8] sm:$0xff] }
  0xbf   :  { %2137 = vmatpush1.bf16.msra.mxu0 %v3509_v52  ;;  %2260 = vmatpush1.bf16.msra.mxu1 %v3511_v54  ;;  %v3576_v52 = vcombine.high %v380_v47, %v384_v48  ;;  %v387_v54 = vld [vmem:[#allocation5 + $0x940] sm:$0xff] }
  0xc0   :  { %2138 = vmatprep.subr.bf16.mxu0 %v3518_v55  ;;  %2261 = vmatprep.subr.bf16.mxu1 %v3520_v60  ;;  %v391_v55 = vld [vmem:[#allocation5 + $0x960] sm:$0xff]  ;;  %v3575_v60 = vcombine.low %v380_v47, %v384_v48  ;;  %v3307_v48 = vcombine.low %v110_v36, %v114_v37 }
  0xc1   :  { %v3582_v61 = vcombine.high %v387_v54, %v391_v55  ;;  %v3581_v3 = vcombine.low %v387_v54, %v391_v55  ;;  %v126_v54 = vld [vmem:[#allocation5 + $0x118] sm:$0xff] }
  0xc2   :  { %v130_v55 = vld [vmem:[#allocation5 + $0x138] sm:$0xff] }
  0xc3   :  { %2139 = vmatpush1.bf16.msra.mxu0 %v3517_v62  ;;  %2262 = vmatpush1.bf16.msra.mxu1 %v3519_v63  ;;  %v3584_v62 = vcombine.high %v388_v56, %v392_v58  ;;  %v395_v63 = vld [vmem:[#allocation5 + $0x980] sm:$0xff] }
  0xc4   :  { %2140 = vmatprep.subr.bf16.mxu0 %v3526_v0  ;;  %2263 = vmatprep.subr.bf16.mxu1 %v3528_v4  ;;  %v399_v0 = vld [vmem:[#allocation5 + $0x9a0] sm:$0xff]  ;;  %v3583_v4 = vcombine.low %v388_v56, %v392_v58  ;;  %v3315_v58 = vcombine.low %v118_v45, %v122_v46 }
  0xc5   :  { %v3590_v5 = vcombine.high %v395_v63, %v399_v0  ;;  %v3589_v11 = vcombine.low %v395_v63, %v399_v0  ;;  %v138_v63 = vld [vmem:[#allocation5 + $0x178] sm:$0xff] }
  0xc7   :  { %2141 = vmatpush1.bf16.msra.mxu0 %v3525_v6  ;;  %2264 = vmatpush1.bf16.msra.mxu1 %v3527_v7  ;;  %v3592_v6 = vcombine.high %v396_v1, %v400_v2  ;;  %v403_v7 = vld [vmem:[#allocation5 + $0x9c0] sm:$0xff] }
  0xc8   :  { %2142 = vmatprep.subr.bf16.mxu0 %v3534_v8  ;;  %2265 = vmatprep.subr.bf16.mxu1 %v3536_v13  ;;  %v407_v8 = vld [vmem:[#allocation5 + $0x9e0] sm:$0xff]  ;;  %v3591_v13 = vcombine.low %v396_v1, %v400_v2  ;;  %v3323_v1 = vcombine.low %v126_v54, %v130_v55 }
  0xc9   :  { %v3598_v14 = vcombine.high %v403_v7, %v407_v8  ;;  %v3597_v21 = vcombine.low %v403_v7, %v407_v8  ;;  %v146_v7 = vld [vmem:[#allocation5 + $0x1b8] sm:$0xff] }
  0xcb   :  { %2143 = vmatpush1.bf16.msra.mxu0 %v3533_v16  ;;  %2266 = vmatpush1.bf16.msra.mxu1 %v3535_v17  ;;  %v3600_v16 = vcombine.high %v404_v9, %v408_v10  ;;  %v93_v17 = vld [vmem:[#allocation5 + $0x10] sm:$0xff] }
  0xcc   :  { %2153 = vmatprep.subr.bf16.mxu0 %v3542_v18  ;;  %2276 = vmatprep.subr.bf16.mxu1 %v3544_v22  ;;  %v97_v18 = vld [vmem:[#allocation5 + $0x30] sm:$0xff]  ;;  %v3599_v22 = vcombine.low %v404_v9, %v408_v10 }
  0xcd   :  { %v3290_v23 = vcombine.high %v93_v17, %v97_v18  ;;  %v3289_v31 = vcombine.low %v93_v17, %v97_v18  ;;  %v154_v17 = vld [vmem:[#allocation5 + $0x1f8] sm:$0xff] }
  0xce   :  { %2145 = vmatmul.mubr.bf16.vlgmr.msra.gmra.mrb[0].mxu0 %v4101_v24  ;;  %2268 = vmatmul.mubr.bf16.vlgmr.msra.gmra.mrb[0].mxu1 %v4101_v24 }
  0xcf   :  { %2154 = vmatpush1.bf16.msra.mxu0 %v3541_v25  ;;  %2277 = vmatpush1.bf16.msra.mxu1 %v3543_v26  ;;  %v3292_v25 = vcombine.high %v94_v19, %v98_v20  ;;  %v101_v26 = vld [vmem:[#allocation5 + $0x50] sm:$0xff] }
  0xd0   :  { %2155 = vmatprep.subr.bf16.mxu0 %v3550_v27  ;;  %2278 = vmatprep.subr.bf16.mxu1 %v3552_v28  ;;  %v105_v27 = vld [vmem:[#allocation5 + $0x70] sm:$0xff]  ;;  %v4107_v28 = vld [vmem:[#allocation2 + $0x10] ss:$0 sps:$4 sm:$0xff]  }
  0xd1   :  { %2185 = vmatprep.mubr.bf16.mxu0 %v4002_v38  ;;  %2308 = vmatprep.mubr.bf16.mxu1 %v4002_v38  ;;  %v3297_v39 = vcombine.low %v101_v26, %v105_v27 }
  0xd3   :  { %2156 = vmatpush1.bf16.msra.mxu0 %v3549_v33  ;;  %2279 = vmatpush1.bf16.msra.mxu1 %v3551_v15  ;;  %v3298_v33 = vcombine.high %v101_v26, %v105_v27  ;;  %v3300_v15 = vcombine.high %v102_v29, %v106_v30  ;;  %v162_v26 = vld [vmem:[#allocation5 + $0x238] sm:$0xff] }
  0xd4   :  { %2157 = vmatprep.subr.bf16.mxu0 %v3558_v34  ;;  %2280 = vmatprep.subr.bf16.mxu1 %v3560_v35  ;;  %v109_v34 = vld [vmem:[#allocation5 + $0x90] sm:$0xff] }
  0xd5   :  { %v113_v35 = vld [vmem:[#allocation5 + $0xb0] sm:$0xff] }
  0xd6   :  { %v3305_v47 = vcombine.low %v109_v34, %v113_v35 }
  0xd7   :  { %2158 = vmatpush1.bf16.msra.mxu0 %v3557_v41  ;;  %2281 = vmatpush1.bf16.msra.mxu1 %v3559_v42  ;;  %v3306_v41 = vcombine.high %v109_v34, %v113_v35  ;;  %v3308_v42 = vcombine.high %v110_v36, %v114_v37  ;;  %v170_v34 = vld [vmem:[#allocation5 + $0x278] sm:$0xff] }
  0xd8   :  { %2159 = vmatprep.subr.bf16.mxu0 %v3566_v43  ;;  %2282 = vmatprep.subr.bf16.mxu1 %v3568_v44  ;;  %v117_v43 = vld [vmem:[#allocation5 + $0xd0] sm:$0xff] }
  0xd9   :  { %v121_v44 = vld [vmem:[#allocation5 + $0xf0] sm:$0xff] }
  0xda   :  { %v3313_v56 = vcombine.low %v117_v43, %v121_v44 }
  0xdb   :  { %2160 = vmatpush1.bf16.msra.mxu0 %v3565_v49  ;;  %2283 = vmatpush1.bf16.msra.mxu1 %v3567_v50  ;;  %v3314_v49 = vcombine.high %v117_v43, %v121_v44  ;;  %v3316_v50 = vcombine.high %v118_v45, %v122_v46  ;;  %v178_v43 = vld [vmem:[#allocation5 + $0x2b8] sm:$0xff] }
  0xdc   :  { %2161 = vmatprep.subr.bf16.mxu0 %v3574_v51  ;;  %2284 = vmatprep.subr.bf16.mxu1 %v3576_v52  ;;  %v125_v51 = vld [vmem:[#allocation5 + $0x110] sm:$0xff] }
  0xdd   :  { %v129_v52 = vld [vmem:[#allocation5 + $0x130] sm:$0xff] }
  0xde   :  { %v3321_v0 = vcombine.low %v125_v51, %v129_v52 }
  0xdf   :  { %2162 = vmatpush1.bf16.msra.mxu0 %v3573_v59  ;;  %2285 = vmatpush1.bf16.msra.mxu1 %v3575_v60  ;;  %v3322_v59 = vcombine.high %v125_v51, %v129_v52  ;;  %v133_v60 = vld [vmem:[#allocation5 + $0x150] sm:$0xff]  ;;  %v186_v51 = vld [vmem:[#allocation5 + $0x2f8] sm:$0xff] }
  0xe0   :  { %2163 = vmatprep.subr.bf16.mxu0 %v3582_v61  ;;  %2286 = vmatprep.subr.bf16.mxu1 %v3584_v62  ;;  %v137_v61 = vld [vmem:[#allocation5 + $0x170] sm:$0xff]  ;;  %v134_v62 = vld [vmem:[#allocation5 + $0x158] sm:$0xff] }
  0xe1   :  { %v3330_v2 = vcombine.high %v133_v60, %v137_v61  ;;  %v3329_v8 = vcombine.low %v133_v60, %v137_v61  ;;  %v3331_v9 = vcombine.low %v134_v62, %v138_v63  ;;  %v194_v60 = vld [vmem:[#allocation5 + $0x338] sm:$0xff] }
  0xe3   :  { %2164 = vmatpush1.bf16.msra.mxu0 %v3581_v3  ;;  %2287 = vmatpush1.bf16.msra.mxu1 %v3583_v4  ;;  %v3332_v3 = vcombine.high %v134_v62, %v138_v63  ;;  %v141_v4 = vld [vmem:[#allocation5 + $0x190] sm:$0xff] }
  0xe4   :  { %2165 = vmatprep.subr.bf16.mxu0 %v3590_v5  ;;  %2288 = vmatprep.subr.bf16.mxu1 %v3592_v6  ;;  %v145_v5 = vld [vmem:[#allocation5 + $0x1b0] sm:$0xff]  ;;  %v142_v6 = vld [vmem:[#allocation5 + $0x198] sm:$0xff] }
  0xe5   :  { %v3338_v10 = vcombine.high %v141_v4, %v145_v5  ;;  %v3337_v18 = vcombine.low %v141_v4, %v145_v5  ;;  %v3339_v19 = vcombine.low %v142_v6, %v146_v7  ;;  %v202_v4 = vld [vmem:[#allocation5 + $0x378] sm:$0xff] }
  0xe7   :  { %2166 = vmatpush1.bf16.msra.mxu0 %v3589_v11  ;;  %2289 = vmatpush1.bf16.msra.mxu1 %v3591_v13  ;;  %v3340_v11 = vcombine.high %v142_v6, %v146_v7  ;;  %v149_v13 = vld [vmem:[#allocation5 + $0x1d0] sm:$0xff] }
  0xe8   :  { %2167 = vmatprep.subr.bf16.mxu0 %v3598_v14  ;;  %2290 = vmatprep.subr.bf16.mxu1 %v3600_v16  ;;  %v153_v14 = vld [vmem:[#allocation5 + $0x1f0] sm:$0xff]  ;;  %v150_v16 = vld [vmem:[#allocation5 + $0x1d8] sm:$0xff] }
  0xe9   :  { %v3346_v20 = vcombine.high %v149_v13, %v153_v14  ;;  %v3345_v27 = vcombine.low %v149_v13, %v153_v14  ;;  %v3347_v29 = vcombine.low %v150_v16, %v154_v17  ;;  %v210_v13 = vld [vmem:[#allocation5 + $0x3b8] sm:$0xff] }
  0xeb   :  { %2168 = vmatpush1.bf16.msra.mxu0 %v3597_v21  ;;  %2291 = vmatpush1.bf16.msra.mxu1 %v3599_v22  ;;  %v3348_v21 = vcombine.high %v150_v16, %v154_v17  ;;  %v157_v22 = vld [vmem:[#allocation5 + $0x210] sm:$0xff] }
  0xec   :  { %2317 = vmatprep.subr.bf16.mxu0 %v3290_v23  ;;  %2440 = vmatprep.subr.bf16.mxu1 %v3292_v25  ;;  %v161_v23 = vld [vmem:[#allocation5 + $0x230] sm:$0xff]  ;;  %v158_v25 = vld [vmem:[#allocation5 + $0x218] sm:$0xff] }
  0xed   :  { %v3354_v30 = vcombine.high %v157_v22, %v161_v23  ;;  %v3353_v35 = vcombine.low %v157_v22, %v161_v23  ;;  %v3355_v36 = vcombine.low %v158_v25, %v162_v26  ;;  %v218_v22 = vld [vmem:[#allocation5 + $0x3f8] sm:$0xff] }
  0xee   :  { %2186 = vmatmul.mubr.bf16.vlgmr.msra.gmra.mrb[0].mxu0 %v4107_v28  ;;  %2309 = vmatmul.mubr.bf16.vlgmr.msra.gmra.mrb[0].mxu1 %v4107_v28 }
  0xef   :  { %2318 = vmatpush1.bf16.msra.mxu0 %v3289_v31  ;;  %2441 = vmatpush1.bf16.msra.mxu1 %v3291_v32  ;;  %v3356_v31 = vcombine.high %v158_v25, %v162_v26  ;;  %v165_v32 = vld [vmem:[#allocation5 + $0x250] sm:$0xff] }
  0xf0   :  { %2319 = vmatprep.subr.bf16.mxu0 %v3298_v33  ;;  %2442 = vmatprep.subr.bf16.mxu1 %v3300_v15  ;;  %v169_v33 = vld [vmem:[#allocation5 + $0x270] sm:$0xff]  ;;  %v166_v15 = vld [vmem:[#allocation5 + $0x258] sm:$0xff] }
  0xf1   :  { %2349 = vmatprep.mubr.bf16.mxu0 %v4081_v57  ;;  %2472 = vmatprep.mubr.bf16.mxu1 %v4081_v57  ;;  %v3324_v57 = vcombine.high %v126_v54, %v130_v55  ;;  %v3362_v37 = vcombine.high %v165_v32, %v169_v33  ;;  %v3361_v44 = vcombine.low %v165_v32, %v169_v33  ;;  %v226_v32 = vld [vmem:[#allocation5 + $0x438] sm:$0xff] }
  0xf2   :  { %v3363_v45 = vcombine.low %v166_v15, %v170_v34 }
  0xf3   :  { %2320 = vmatpush1.bf16.msra.mxu0 %v3297_v39  ;;  %2443 = vmatpush1.bf16.msra.mxu1 %v3299_v40  ;;  %v3364_v39 = vcombine.high %v166_v15, %v170_v34  ;;  %v173_v40 = vld [vmem:[#allocation5 + $0x290] sm:$0xff] }
  0xf4   :  { %2321 = vmatprep.subr.bf16.mxu0 %v3306_v41  ;;  %2444 = vmatprep.subr.bf16.mxu1 %v3308_v42  ;;  %v177_v41 = vld [vmem:[#allocation5 + $0x2b0] sm:$0xff]  ;;  %v174_v42 = vld [vmem:[#allocation5 + $0x298] sm:$0xff] }
  0xf5   :  { %v3370_v46 = vcombine.high %v173_v40, %v177_v41  ;;  %v3369_v52 = vcombine.low %v173_v40, %v177_v41  ;;  %v3371_v54 = vcombine.low %v174_v42, %v178_v43  ;;  %v234_v40 = vld [vmem:[#allocation5 + $0x478] sm:$0xff] }
  0xf7   :  { %2322 = vmatpush1.bf16.msra.mxu0 %v3305_v47  ;;  %2445 = vmatpush1.bf16.msra.mxu1 %v3307_v48  ;;  %v3372_v47 = vcombine.high %v174_v42, %v178_v43  ;;  %v181_v48 = vld [vmem:[#allocation5 + $0x2d0] sm:$0xff] }
  0xf8   :  { %2323 = vmatprep.subr.bf16.mxu0 %v3314_v49  ;;  %2446 = vmatprep.subr.bf16.mxu1 %v3316_v50  ;;  %v185_v49 = vld [vmem:[#allocation5 + $0x2f0] sm:$0xff]  ;;  %v182_v50 = vld [vmem:[#allocation5 + $0x2d8] sm:$0xff] }
  0xf9   :  { %v3378_v55 = vcombine.high %v181_v48, %v185_v49  ;;  %v3377_v61 = vcombine.low %v181_v48, %v185_v49  ;;  %v3379_v62 = vcombine.low %v182_v50, %v186_v51  ;;  %v242_v48 = vld [vmem:[#allocation5 + $0x4b8] sm:$0xff] }
  0xfb   :  { %2324 = vmatpush1.bf16.msra.mxu0 %v3313_v56  ;;  %2447 = vmatpush1.bf16.msra.mxu1 %v3315_v58  ;;  %v3380_v56 = vcombine.high %v182_v50, %v186_v51  ;;  %v189_v58 = vld [vmem:[#allocation5 + $0x310] sm:$0xff] }
  0xfc   :  { %2325 = vmatprep.subr.bf16.mxu0 %v3322_v59  ;;  %2448 = vmatprep.subr.bf16.mxu1 %v3324_v57  ;;  %v193_v59 = vld [vmem:[#allocation5 + $0x330] sm:$0xff]  ;;  %v190_v57 = vld [vmem:[#allocation5 + $0x318] sm:$0xff] }
  0xfd   :  { %v3386_v63 = vcombine.high %v189_v58, %v193_v59  ;;  %v3385_v5 = vcombine.low %v189_v58, %v193_v59  ;;  %v3387_v6 = vcombine.low %v190_v57, %v194_v60  ;;  %v250_v58 = vld [vmem:[#allocation5 + $0x4f8] sm:$0xff] }
  0xff   :  { %2326 = vmatpush1.bf16.msra.mxu0 %v3321_v0  ;;  %2449 = vmatpush1.bf16.msra.mxu1 %v3323_v1  ;;  %v3388_v0 = vcombine.high %v190_v57, %v194_v60  ;;  %v197_v1 = vld [vmem:[#allocation5 + $0x350] sm:$0xff] }
 0x100   :  { %2327 = vmatprep.subr.bf16.mxu0 %v3330_v2  ;;  %2450 = vmatprep.subr.bf16.mxu1 %v3332_v3  ;;  %v201_v2 = vld [vmem:[#allocation5 + $0x370] sm:$0xff]  ;;  %v198_v3 = vld [vmem:[#allocation5 + $0x358] sm:$0xff] }
 0x101   :  { %v3394_v7 = vcombine.high %v197_v1, %v201_v2  ;;  %v3393_v14 = vcombine.low %v197_v1, %v201_v2  ;;  %v3395_v16 = vcombine.low %v198_v3, %v202_v4 }
 0x103   :  { %2328 = vmatpush1.bf16.msra.mxu0 %v3329_v8  ;;  %2451 = vmatpush1.bf16.msra.mxu1 %v3331_v9  ;;  %v3396_v8 = vcombine.high %v198_v3, %v202_v4  ;;  %v205_v9 = vld [vmem:[#allocation5 + $0x390] sm:$0xff] }
 0x104   :  { %2329 = vmatprep.subr.bf16.mxu0 %v3338_v10  ;;  %2452 = vmatprep.subr.bf16.mxu1 %v3340_v11  ;;  %v209_v10 = vld [vmem:[#allocation5 + $0x3b0] sm:$0xff]  ;;  %v206_v11 = vld [vmem:[#allocation5 + $0x398] sm:$0xff] }
 0x105   :  { %v3402_v17 = vcombine.high %v205_v9, %v209_v10  ;;  %v3401_v23 = vcombine.low %v205_v9, %v209_v10  ;;  %v3403_v25 = vcombine.low %v206_v11, %v210_v13  ;;  %v261_v4 = vld [vmem:[#allocation5 + $0x550] sm:$0xff] }
 0x107   :  { %2330 = vmatpush1.bf16.msra.mxu0 %v3337_v18  ;;  %2453 = vmatpush1.bf16.msra.mxu1 %v3339_v19  ;;  %v3404_v18 = vcombine.high %v206_v11, %v210_v13  ;;  %v213_v19 = vld [vmem:[#allocation5 + $0x3d0] sm:$0xff] }
 0x108   :  { %2331 = vmatprep.subr.bf16.mxu0 %v3346_v20  ;;  %2454 = vmatprep.subr.bf16.mxu1 %v3348_v21  ;;  %v217_v20 = vld [vmem:[#allocation5 + $0x3f0] sm:$0xff]  ;;  %v214_v21 = vld [vmem:[#allocation5 + $0x3d8] sm:$0xff] }
 0x109   :  { %v3410_v26 = vcombine.high %v213_v19, %v217_v20  ;;  %v3409_v33 = vcombine.low %v213_v19, %v217_v20  ;;  %v3411_v15 = vcombine.low %v214_v21, %v218_v22  ;;  %v269_v13 = vld [vmem:[#allocation5 + $0x590] sm:$0xff] }
 0x10b   :  { %2332 = vmatpush1.bf16.msra.mxu0 %v3345_v27  ;;  %2455 = vmatpush1.bf16.msra.mxu1 %v3347_v29  ;;  %v3412_v27 = vcombine.high %v214_v21, %v218_v22  ;;  %v221_v29 = vld [vmem:[#allocation5 + $0x410] sm:$0xff] }
 0x10c   :  { %2333 = vmatprep.subr.bf16.mxu0 %v3354_v30  ;;  %2456 = vmatprep.subr.bf16.mxu1 %v3356_v31  ;;  %v225_v30 = vld [vmem:[#allocation5 + $0x430] sm:$0xff]  ;;  %v222_v31 = vld [vmem:[#allocation5 + $0x418] sm:$0xff] }
 0x10d   :  { %v3418_v34 = vcombine.high %v221_v29, %v225_v30  ;;  %v3417_v41 = vcombine.low %v221_v29, %v225_v30  ;;  %v3419_v42 = vcombine.low %v222_v31, %v226_v32  ;;  %v277_v22 = vld [vmem:[#allocation5 + $0x5d0] sm:$0xff] }
 0x10f   :  { %2334 = vmatpush1.bf16.msra.mxu0 %v3353_v35  ;;  %2457 = vmatpush1.bf16.msra.mxu1 %v3355_v36  ;;  %v3420_v35 = vcombine.high %v222_v31, %v226_v32  ;;  %v229_v36 = vld [vmem:[#allocation5 + $0x450] sm:$0xff] }
 0x110   :  { %2335 = vmatprep.subr.bf16.mxu0 %v3362_v37  ;;  %2458 = vmatprep.subr.bf16.mxu1 %v3364_v39  ;;  %v233_v37 = vld [vmem:[#allocation5 + $0x470] sm:$0xff]  ;;  %v230_v39 = vld [vmem:[#allocation5 + $0x458] sm:$0xff] }
 0x111   :  { %v3426_v43 = vcombine.high %v229_v36, %v233_v37  ;;  %v3425_v49 = vcombine.low %v229_v36, %v233_v37  ;;  %v3427_v50 = vcombine.low %v230_v39, %v234_v40  ;;  %v285_v32 = vld [vmem:[#allocation5 + $0x610] sm:$0xff] }
 0x113   :  { %2336 = vmatpush1.bf16.msra.mxu0 %v3361_v44  ;;  %2459 = vmatpush1.bf16.msra.mxu1 %v3363_v45  ;;  %v3428_v44 = vcombine.high %v230_v39, %v234_v40  ;;  %v237_v45 = vld [vmem:[#allocation5 + $0x490] sm:$0xff] }
 0x114   :  { %2337 = vmatprep.subr.bf16.mxu0 %v3370_v46  ;;  %2460 = vmatprep.subr.bf16.mxu1 %v3372_v47  ;;  %v241_v46 = vld [vmem:[#allocation5 + $0x4b0] sm:$0xff]  ;;  %v238_v47 = vld [vmem:[#allocation5 + $0x498] sm:$0xff] }
 0x115   :  { %v3434_v51 = vcombine.high %v237_v45, %v241_v46  ;;  %v3433_v59 = vcombine.low %v237_v45, %v241_v46  ;;  %v293_v40 = vld [vmem:[#allocation5 + $0x650] sm:$0xff] }
 0x117   :  { %2338 = vmatpush1.bf16.msra.mxu0 %v3369_v52  ;;  %2461 = vmatpush1.bf16.msra.mxu1 %v3371_v54  ;;  %v3436_v52 = vcombine.high %v238_v47, %v242_v48  ;;  %v245_v54 = vld [vmem:[#allocation5 + $0x4d0] sm:$0xff] }
 0x118   :  { %2339 = vmatprep.subr.bf16.mxu0 %v3378_v55  ;;  %2462 = vmatprep.subr.bf16.mxu1 %v3380_v56  ;;  %v249_v55 = vld [vmem:[#allocation5 + $0x4f0] sm:$0xff]  ;;  %v246_v56 = vld [vmem:[#allocation5 + $0x4d8] sm:$0xff] }
 0x119   :  { %v3442_v57 = vcombine.high %v245_v54, %v249_v55  ;;  %v3444_v60 = vcombine.high %v246_v56, %v250_v58  ;;  %v3441_v1 = vcombine.low %v245_v54, %v249_v55  ;;  %v3443_v2 = vcombine.low %v246_v56, %v250_v58  ;;  %v309_v58 = vld [vmem:[#allocation5 + $0x6d0] sm:$0xff] }
 0x11b   :  { %2340 = vmatpush1.bf16.msra.mxu0 %v3377_v61  ;;  %2463 = vmatpush1.bf16.msra.mxu1 %v3379_v62  ;;  %v253_v61 = vld [vmem:[#allocation5 + $0x510] sm:$0xff] }
 0x11c   :  { %2341 = vmatprep.subr.bf16.mxu0 %v3386_v63  ;;  %2464 = vmatprep.subr.bf16.mxu1 %v3388_v0  ;;  %v257_v62 = vld [vmem:[#allocation5 + $0x530] sm:$0xff]  ;;  %v254_v63 = vld [vmem:[#allocation5 + $0x518] sm:$0xff] }
 0x11d   :  { %v258_v0 = vld [vmem:[#allocation5 + $0x538] sm:$0xff]  ;;  %v3450_v3 = vcombine.high %v253_v61, %v257_v62 }
 0x11e   :  { %v3451_v9 = vcombine.low %v254_v63, %v258_v0 }
 0x11f   :  { %2342 = vmatpush1.bf16.msra.mxu0 %v3385_v5  ;;  %2465 = vmatpush1.bf16.msra.mxu1 %v3387_v6  ;;  %v265_v5 = vld [vmem:[#allocation5 + $0x570] sm:$0xff]  ;;  %v262_v6 = vld [vmem:[#allocation5 + $0x558] sm:$0xff] }
 0x120   :  { %2343 = vmatprep.subr.bf16.mxu0 %v3394_v7  ;;  %2466 = vmatprep.subr.bf16.mxu1 %v3396_v8  ;;  %v266_v7 = vld [vmem:[#allocation5 + $0x578] sm:$0xff]  ;;  %v3449_v8 = vcombine.low %v253_v61, %v257_v62  ;;  %v3458_v10 = vcombine.high %v261_v4, %v265_v5 }
 0x121   :  { %v3460_v11 = vcombine.high %v262_v6, %v266_v7  ;;  %v3459_v19 = vcombine.low %v262_v6, %v266_v7  ;;  %v325_v7 = vld [vmem:[#allocation5 + $0x750] sm:$0xff] }
 0x123   :  { %2344 = vmatpush1.bf16.msra.mxu0 %v3393_v14  ;;  %2467 = vmatpush1.bf16.msra.mxu1 %v3395_v16  ;;  %v273_v14 = vld [vmem:[#allocation5 + $0x5b0] sm:$0xff]  ;;  %v270_v16 = vld [vmem:[#allocation5 + $0x598] sm:$0xff] }
 0x124   :  { %2345 = vmatprep.subr.bf16.mxu0 %v3402_v17  ;;  %2468 = vmatprep.subr.bf16.mxu1 %v3404_v18  ;;  %v274_v17 = vld [vmem:[#allocation5 + $0x5b8] sm:$0xff]  ;;  %v3457_v18 = vcombine.low %v261_v4, %v265_v5  ;;  %v3466_v20 = vcombine.high %v269_v13, %v273_v14 }
 0x125   :  { %v3468_v21 = vcombine.high %v270_v16, %v274_v17  ;;  %v3467_v29 = vcombine.low %v270_v16, %v274_v17  ;;  %v333_v17 = vld [vmem:[#allocation5 + $0x790] sm:$0xff] }
 0x127   :  { %2346 = vmatpush1.bf16.msra.mxu0 %v3401_v23  ;;  %2469 = vmatpush1.bf16.msra.mxu1 %v3403_v25  ;;  %v281_v23 = vld [vmem:[#allocation5 + $0x5f0] sm:$0xff]  ;;  %v278_v25 = vld [vmem:[#allocation5 + $0x5d8] sm:$0xff] }
 0x128   :  { %2347 = vmatprep.subr.bf16.mxu0 %v3410_v26  ;;  %2470 = vmatprep.subr.bf16.mxu1 %v3412_v27  ;;  %v282_v26 = vld [vmem:[#allocation5 + $0x5f8] sm:$0xff]  ;;  %v3465_v27 = vcombine.low %v269_v13, %v273_v14  ;;  %v3474_v30 = vcombine.high %v277_v22, %v281_v23 }
 0x129   :  { %v3476_v31 = vcombine.high %v278_v25, %v282_v26  ;;  %v3475_v36 = vcombine.low %v278_v25, %v282_v26  ;;  %v341_v26 = vld [vmem:[#allocation5 + $0x7d0] sm:$0xff] }
 0x12b   :  { %2348 = vmatpush1.bf16.msra.mxu0 %v3409_v33  ;;  %2471 = vmatpush1.bf16.msra.mxu1 %v3411_v15  ;;  %v289_v33 = vld [vmem:[#allocation5 + $0x630] sm:$0xff]  ;;  %v286_v15 = vld [vmem:[#allocation5 + $0x618] sm:$0xff] }
 0x12c   :  { %2358 = vmatprep.subr.bf16.mxu0 %v3418_v34  ;;  %2481 = vmatprep.subr.bf16.mxu1 %v3420_v35  ;;  %v290_v34 = vld [vmem:[#allocation5 + $0x638] sm:$0xff]  ;;  %v3473_v35 = vcombine.low %v277_v22, %v281_v23  ;;  %v3482_v37 = vcombine.high %v285_v32, %v289_v33 }
 0x12d   :  { %v3484_v39 = vcombine.high %v286_v15, %v290_v34  ;;  %v3483_v45 = vcombine.low %v286_v15, %v290_v34  ;;  %v349_v34 = vld [vmem:[#allocation5 + $0x810] sm:$0xff] }
 0x12e   :  { %2350 = vmatmul.mubr.bf16.vlgmr.msra.gmra.mrb[4].mxu0 %v4087_v12  ;;  %2473 = vmatmul.mubr.bf16.vlgmr.msra.gmra.mrb[4].mxu1 %v4087_v12  ;;  %v3435_v12 = vcombine.low %v238_v47, %v242_v48  ;;  %v301_v48 = vld [vmem:[#allocation5 + $0x690] sm:$0xff] }
 0x12f   :  { %2359 = vmatpush1.bf16.msra.mxu0 %v3417_v41  ;;  %2482 = vmatpush1.bf16.msra.mxu1 %v3419_v42  ;;  %v297_v41 = vld [vmem:[#allocation5 + $0x670] sm:$0xff]  ;;  %v294_v42 = vld [vmem:[#allocation5 + $0x658] sm:$0xff] }
 0x130   :  { %2360 = vmatprep.subr.bf16.mxu0 %v3426_v43  ;;  %2483 = vmatprep.subr.bf16.mxu1 %v3428_v44  ;;  %v298_v43 = vld [vmem:[#allocation5 + $0x678] sm:$0xff]  ;;  %v3481_v44 = vcombine.low %v285_v32, %v289_v33  ;;  %v3490_v46 = vcombine.high %v293_v40, %v297_v41 }
 0x131   :  { %2390 = vmatprep.mubr.bf16.mxu0 %v4093_v53  ;;  %2513 = vmatprep.mubr.bf16.mxu1 %v4093_v53  ;;  %v3452_v53 = vcombine.high %v254_v63, %v258_v0  ;;  %v3492_v47 = vcombine.high %v294_v42, %v298_v43  ;;  %v3491_v54 = vcombine.low %v294_v42, %v298_v43  ;;  %v317_v0 = vld [vmem:[#allocation5 + $0x710] sm:$0xff] }
 0x132   :  { %v357_v43 = vld [vmem:[#allocation5 + $0x850] sm:$0xff] }
 0x133   :  { %2361 = vmatpush1.bf16.msra.mxu0 %v3425_v49  ;;  %2484 = vmatpush1.bf16.msra.mxu1 %v3427_v50  ;;  %v305_v49 = vld [vmem:[#allocation5 + $0x6b0] sm:$0xff]  ;;  %v302_v50 = vld [vmem:[#allocation5 + $0x698] sm:$0xff] }
 0x134   :  { %2362 = vmatprep.subr.bf16.mxu0 %v3434_v51  ;;  %2485 = vmatprep.subr.bf16.mxu1 %v3436_v52  ;;  %v306_v51 = vld [vmem:[#allocation5 + $0x6b8] sm:$0xff]  ;;  %v3489_v52 = vcombine.low %v293_v40, %v297_v41  ;;  %v3498_v55 = vcombine.high %v301_v48, %v305_v49 }
 0x135   :  { %v3500_v56 = vcombine.high %v302_v50, %v306_v51  ;;  %v3499_v61 = vcombine.low %v302_v50, %v306_v51  ;;  %v365_v51 = vld [vmem:[#allocation5 + $0x890] sm:$0xff] }
 0x137   :  { %2363 = vmatpush1.bf16.msra.mxu0 %v3433_v59  ;;  %2486 = vmatpush1.bf16.msra.mxu1 %v3435_v12  ;;  %v313_v59 = vld [vmem:[#allocation5 + $0x6f0] sm:$0xff]  ;;  %v310_v12 = vld [vmem:[#allocation5 + $0x6d8] sm:$0xff] }
 0x138   :  { %2364 = vmatprep.subr.bf16.mxu0 %v3442_v57  ;;  %2487 = vmatprep.subr.bf16.mxu1 %v3444_v60  ;;  %v314_v57 = vld [vmem:[#allocation5 + $0x6f8] sm:$0xff]  ;;  %v3497_v60 = vcombine.low %v301_v48, %v305_v49  ;;  %v3506_v62 = vcombine.high %v309_v58, %v313_v59 }
 0x139   :  { %v3508_v63 = vcombine.high %v310_v12, %v314_v57  ;;  %v3507_v4 = vcombine.low %v310_v12, %v314_v57  ;;  %v373_v57 = vld [vmem:[#allocation5 + $0x8d0] sm:$0xff] }
 0x13b   :  { %2365 = vmatpush1.bf16.msra.mxu0 %v3441_v1  ;;  %2488 = vmatpush1.bf16.msra.mxu1 %v3443_v2  ;;  %v321_v1 = vld [vmem:[#allocation5 + $0x730] sm:$0xff]  ;;  %v318_v2 = vld [vmem:[#allocation5 + $0x718] sm:$0xff] }
 0x13c   :  { %2366 = vmatprep.subr.bf16.mxu0 %v3450_v3  ;;  %2489 = vmatprep.subr.bf16.mxu1 %v3452_v53  ;;  %v322_v3 = vld [vmem:[#allocation5 + $0x738] sm:$0xff]  ;;  %v3505_v53 = vcombine.low %v309_v58, %v313_v59  ;;  %v3514_v5 = vcombine.high %v317_v0, %v321_v1 }
 0x13d   :  { %v3516_v6 = vcombine.high %v318_v2, %v322_v3  ;;  %v3515_v13 = vcombine.low %v318_v2, %v322_v3  ;;  %v381_v2 = vld [vmem:[#allocation5 + $0x910] sm:$0xff] }
 0x13e   :  { %v385_v3 = vld [vmem:[#allocation5 + $0x930] sm:$0xff] }
 0x13f   :  { %2367 = vmatpush1.bf16.msra.mxu0 %v3449_v8  ;;  %2490 = vmatpush1.bf16.msra.mxu1 %v3451_v9  ;;  %v329_v8 = vld [vmem:[#allocation5 + $0x770] sm:$0xff]  ;;  %v326_v9 = vld [vmem:[#allocation5 + $0x758] sm:$0xff] }
 0x140   :  { %2368 = vmatprep.subr.bf16.mxu0 %v3458_v10  ;;  %2491 = vmatprep.subr.bf16.mxu1 %v3460_v11  ;;  %v330_v10 = vld [vmem:[#allocation5 + $0x778] sm:$0xff]  ;;  %v3513_v11 = vcombine.low %v317_v0, %v321_v1  ;;  %v3522_v14 = vcombine.high %v325_v7, %v329_v8 }
 0x141   :  { %v3524_v16 = vcombine.high %v326_v9, %v330_v10  ;;  %v3523_v22 = vcombine.low %v326_v9, %v330_v10  ;;  %v393_v9 = vld [vmem:[#allocation5 + $0x970] sm:$0xff]  ;;  %v390_v10 = vld [vmem:[#allocation5 + $0x958] sm:$0xff] }
 0x143   :  { %2369 = vmatpush1.bf16.msra.mxu0 %v3457_v18  ;;  %2492 = vmatpush1.bf16.msra.mxu1 %v3459_v19  ;;  %v337_v18 = vld [vmem:[#allocation5 + $0x7b0] sm:$0xff]  ;;  %v334_v19 = vld [vmem:[#allocation5 + $0x798] sm:$0xff] }
 0x144   :  { %2370 = vmatprep.subr.bf16.mxu0 %v3466_v20  ;;  %2493 = vmatprep.subr.bf16.mxu1 %v3468_v21  ;;  %v338_v20 = vld [vmem:[#allocation5 + $0x7b8] sm:$0xff]  ;;  %v3521_v21 = vcombine.low %v325_v7, %v329_v8  ;;  %v3530_v23 = vcombine.high %v333_v17, %v337_v18  ;;  %v3578_v7 = vcombine.high %v381_v2, %v385_v3  ;;  %v389_v8 = vld [vmem:[#allocation5 + $0x950] sm:$0xff] }
 0x145   :  { %v3532_v25 = vcombine.high %v334_v19, %v338_v20  ;;  %v3531_v32 = vcombine.low %v334_v19, %v338_v20  ;;  %v401_v19 = vld [vmem:[#allocation5 + $0x9b0] sm:$0xff]  ;;  %v398_v20 = vld [vmem:[#allocation5 + $0x998] sm:$0xff] }
 0x147   :  { %2371 = vmatpush1.bf16.msra.mxu0 %v3465_v27  ;;  %2494 = vmatpush1.bf16.msra.mxu1 %v3467_v29  ;;  %v345_v27 = vld [vmem:[#allocation5 + $0x7f0] sm:$0xff]  ;;  %v342_v29 = vld [vmem:[#allocation5 + $0x7d8] sm:$0xff] }
 0x148   :  { %2372 = vmatprep.subr.bf16.mxu0 %v3474_v30  ;;  %2495 = vmatprep.subr.bf16.mxu1 %v3476_v31  ;;  %v346_v30 = vld [vmem:[#allocation5 + $0x7f8] sm:$0xff]  ;;  %v3529_v31 = vcombine.low %v333_v17, %v337_v18  ;;  %v3538_v33 = vcombine.high %v341_v26, %v345_v27  ;;  %v397_v18 = vld [vmem:[#allocation5 + $0x990] sm:$0xff] }
 0x149   :  { %v3540_v15 = vcombine.high %v342_v29, %v346_v30  ;;  %v3539_v40 = vcombine.low %v342_v29, %v346_v30  ;;  %v409_v29 = vld [vmem:[#allocation5 + $0x9f0] sm:$0xff]  ;;  %v406_v30 = vld [vmem:[#allocation5 + $0x9d8] sm:$0xff] }
 0x14b   :  { %2373 = vmatpush1.bf16.msra.mxu0 %v3473_v35  ;;  %2496 = vmatpush1.bf16.msra.mxu1 %v3475_v36  ;;  %v353_v35 = vld [vmem:[#allocation5 + $0x830] sm:$0xff]  ;;  %v350_v36 = vld [vmem:[#allocation5 + $0x818] sm:$0xff] }
 0x14c   :  { %2374 = vmatprep.subr.bf16.mxu0 %v3482_v37  ;;  %2497 = vmatprep.subr.bf16.mxu1 %v3484_v39  ;;  %v354_v37 = vld [vmem:[#allocation5 + $0x838] sm:$0xff]  ;;  %v3537_v39 = vcombine.low %v341_v26, %v345_v27  ;;  %v3546_v41 = vcombine.high %v349_v34, %v353_v35  ;;  %v405_v27 = vld [vmem:[#allocation5 + $0x9d0] sm:$0xff] }
 0x14d   :  { %v3548_v42 = vcombine.high %v350_v36, %v354_v37  ;;  %v3547_v48 = vcombine.low %v350_v36, %v354_v37  ;;  %v3812_v37 = vld [vmem:[#allocation8 + $0x40] sm:$0xff]  }
 0x14f   :  { %2375 = vmatpush1.bf16.msra.mxu0 %v3481_v44  ;;  %2498 = vmatpush1.bf16.msra.mxu1 %v3483_v45  ;;  %v361_v44 = vld [vmem:[#allocation5 + $0x870] sm:$0xff]  ;;  %v358_v45 = vld [vmem:[#allocation5 + $0x858] sm:$0xff] }
 0x150   :  { %2376 = vmatprep.subr.bf16.mxu0 %v3490_v46  ;;  %2499 = vmatprep.subr.bf16.mxu1 %v3492_v47  ;;  %v362_v46 = vld [vmem:[#allocation5 + $0x878] sm:$0xff]  ;;  %v3545_v47 = vcombine.low %v349_v34, %v353_v35  ;;  %v3554_v49 = vcombine.high %v357_v43, %v361_v44  ;;  %v3601_v35 = vcombine.low %v405_v27, %v409_v29 }
 0x151   :  { %v3556_v50 = vcombine.high %v358_v45, %v362_v46  ;;  %v3555_v58 = vcombine.low %v358_v45, %v362_v46  ;;  %v3819_v45 = vld [vmem:[#allocation8 + $0x88] sm:$0xff]   ;;  %v3820_v46 = vld [vmem:[#allocation8 + $0x50] sm:$0xff]  }
 0x153   :  { %2377 = vmatpush1.bf16.msra.mxu0 %v3489_v52  ;;  %2500 = vmatpush1.bf16.msra.mxu1 %v3491_v54  ;;  %v369_v52 = vld [vmem:[#allocation5 + $0x8b0] sm:$0xff]  ;;  %v366_v54 = vld [vmem:[#allocation5 + $0x898] sm:$0xff] }
 0x154   :  { %2378 = vmatprep.subr.bf16.mxu0 %v3498_v55  ;;  %2501 = vmatprep.subr.bf16.mxu1 %v3500_v56  ;;  %v370_v55 = vld [vmem:[#allocation5 + $0x8b8] sm:$0xff]  ;;  %v3553_v56 = vcombine.low %v357_v43, %v361_v44  ;;  %v3562_v59 = vcombine.high %v365_v51, %v369_v52  ;;  %v3817_v43 = vld [vmem:[#allocation8 + $0xc8] sm:$0xff]  }
 0x155   :  { %v3564_v12 = vcombine.high %v366_v54, %v370_v55  ;;  %v3818_v44 = vld [vmem:[#allocation8 + $0x8] sm:$0xff]  }
 0x157   :  { %2379 = vmatpush1.bf16.msra.mxu0 %v3497_v60  ;;  %2502 = vmatpush1.bf16.msra.mxu1 %v3499_v61  ;;  %v377_v60 = vld [vmem:[#allocation5 + $0x8f0] sm:$0xff]  ;;  %v374_v61 = vld [vmem:[#allocation5 + $0x8d8] sm:$0xff] }
 0x158   :  { %2380 = vmatprep.subr.bf16.mxu0 %v3506_v62  ;;  %2503 = vmatprep.subr.bf16.mxu1 %v3508_v63  ;;  %v378_v62 = vld [vmem:[#allocation5 + $0x8f8] sm:$0xff]  ;;  %v3561_v63 = vcombine.low %v365_v51, %v369_v52  ;;  %v3570_v0 = vcombine.high %v373_v57, %v377_v60  ;;  %v3825_v51 = vld [vmem:[#allocation8 + $0xd8] sm:$0xff]  }
 0x159   :  { %v3572_v1 = vcombine.high %v374_v61, %v378_v62  ;;  %v3826_v52 = vld [vmem:[#allocation8 + $0x18] sm:$0xff]  }
 0x15b   :  { %2381 = vmatpush1.bf16.msra.mxu0 %v3505_v53  ;;  %2504 = vmatpush1.bf16.msra.mxu1 %v3507_v4  ;;  %v382_v53 = vld [vmem:[#allocation5 + $0x918] sm:$0xff] }
 0x15c   :  { %2382 = vmatprep.subr.bf16.mxu0 %v3514_v5  ;;  %2505 = vmatprep.subr.bf16.mxu1 %v3516_v6  ;;  %v386_v4 = vld [vmem:[#allocation5 + $0x938] sm:$0xff]  ;;  %v3569_v5 = vcombine.low %v373_v57, %v377_v60  ;;  %v3571_v6 = vcombine.low %v374_v61, %v378_v62  ;;  %v3834_v57 = vld [vmem:[#allocation8 + $0x28] sm:$0xff]  }
 0x15d   :  { %v3835_v60 = vld [vmem:[#allocation8 + $0xa8] sm:$0xff]   ;;  %v3836_v61 = vld [vmem:[#allocation8 + $0x70] sm:$0xff]  }
 0x15e   :  { %v3837_v62 = vld [vmem:[#allocation8 + $0xf0] sm:$0xff]  }
 0x15f   :  { %2383 = vmatpush1.bf16.msra.mxu0 %v3513_v11  ;;  %2506 = vmatpush1.bf16.msra.mxu1 %v3515_v13  ;;  %v394_v11 = vld [vmem:[#allocation5 + $0x978] sm:$0xff]  ;;  %v3577_v13 = vcombine.low %v381_v2, %v385_v3  ;;  %v3842_v2 = vld [vmem:[#allocation8 + $0x38] sm:$0xff]  }
 0x160   :  { %2384 = vmatprep.subr.bf16.mxu0 %v3522_v14  ;;  %2507 = vmatprep.subr.bf16.mxu1 %v3524_v16  ;;  %v3579_v14 = vcombine.low %v382_v53, %v386_v4  ;;  %v3586_v16 = vcombine.high %v389_v8, %v393_v9  ;;  %v3588_v17 = vcombine.high %v390_v10, %v394_v11  ;;  %v3843_v3 = vld [vmem:[#allocation8 + $0xb8] sm:$0xff]  }
 0x163   :  { %2385 = vmatpush1.bf16.msra.mxu0 %v3521_v21  ;;  %2508 = vmatpush1.bf16.msra.mxu1 %v3523_v22  ;;  %v402_v21 = vld [vmem:[#allocation5 + $0x9b8] sm:$0xff]  ;;  %v3585_v22 = vcombine.low %v389_v8, %v393_v9 }
 0x164   :  { %2386 = vmatprep.subr.bf16.mxu0 %v3530_v23  ;;  %2509 = vmatprep.subr.bf16.mxu1 %v3532_v25  ;;  %v3587_v23 = vcombine.low %v390_v10, %v394_v11  ;;  %v3594_v25 = vcombine.high %v397_v18, %v401_v19  ;;  %v3596_v26 = vcombine.high %v398_v20, %v402_v21 }
 0x167   :  { %2387 = vmatpush1.bf16.msra.mxu0 %v3529_v31  ;;  %2510 = vmatpush1.bf16.msra.mxu1 %v3531_v32  ;;  %v410_v31 = vld [vmem:[#allocation5 + $0x9f8] sm:$0xff]  ;;  %v3593_v32 = vcombine.low %v397_v18, %v401_v19 }
 0x168   :  { %2388 = vmatprep.subr.bf16.mxu0 %v3538_v33  ;;  %2511 = vmatprep.subr.bf16.mxu1 %v3540_v15  ;;  %v3595_v33 = vcombine.low %v398_v20, %v402_v21  ;;  %v3602_v15 = vcombine.high %v405_v27, %v409_v29  ;;  %v3604_v34 = vcombine.high %v406_v30, %v410_v31 }
 0x169   :  { %v3603_v36 = vcombine.low %v406_v30, %v410_v31 }
 0x16b   :  { %2389 = vmatpush1.bf16.msra.mxu0 %v3537_v39  ;;  %2512 = vmatpush1.bf16.msra.mxu1 %v3539_v40  ;;  %v3813_v39 = vld [vmem:[#allocation8 + $0xc0] sm:$0xff]  }
 0x16c   :  { %2399 = vmatprep.subr.bf16.mxu0 %v3546_v41  ;;  %2522 = vmatprep.subr.bf16.mxu1 %v3548_v42  ;;  %v3814_v40 = vld [vmem:[#allocation8] sm:$0xff]   ;;  %v3816_v42 = vld [vmem:[#allocation8 + $0x48] sm:$0xff]  }
 0x16d   :  { %v3815_v41 = vld [vmem:[#allocation8 + $0x80] sm:$0xff]  }
 0x16e   :  { %2391 = vmatmul.mubr.bf16.vlgmr.msra.gmra.mrb[4].mxu0 %v4101_v24  ;;  %2514 = vmatmul.mubr.bf16.vlgmr.msra.gmra.mrb[4].mxu1 %v4101_v24  ;;  %v3563_v24 = vcombine.low %v366_v54, %v370_v55  ;;  %v3828_v54 = vld [vmem:[#allocation8 + $0x60] sm:$0xff]  }
 0x16f   :  { %2400 = vmatpush1.bf16.msra.mxu0 %v3545_v47  ;;  %2523 = vmatpush1.bf16.msra.mxu1 %v3547_v48  ;;  %v3821_v47 = vld [vmem:[#allocation8 + $0xd0] sm:$0xff]   ;;  %v3829_v55 = vld [vmem:[#allocation8 + $0xe0] sm:$0xff]  }
 0x170   :  { %2401 = vmatprep.subr.bf16.mxu0 %v3554_v49  ;;  %2524 = vmatprep.subr.bf16.mxu1 %v3556_v50  ;;  %v3822_v48 = vld [vmem:[#allocation8 + $0x10] sm:$0xff]   ;;  %v3824_v50 = vld [vmem:[#allocation8 + $0x58] sm:$0xff]  }
 0x171   :  { %2431 = vmatprep.mubr.bf16.mxu0 %v4002_v38  ;;  %2554 = vmatprep.mubr.bf16.mxu1 %v4002_v38  ;;  %v3580_v38 = vcombine.high %v382_v53, %v386_v4  ;;  %v3823_v49 = vld [vmem:[#allocation8 + $0x90] sm:$0xff]   ;;  %v3844_v53 = vld [vmem:[#allocation8 + $0x140] sm:$0xff]  }
 0x172   :  { %v3845_v4 = vld [vmem:[#allocation8 + $0x1c0] sm:$0xff]  }
 0x173   :  { %2402 = vmatpush1.bf16.msra.mxu0 %v3553_v56  ;;  %2525 = vmatpush1.bf16.msra.mxu1 %v3555_v58  ;;  %v3830_v56 = vld [vmem:[#allocation8 + $0x20] sm:$0xff]  }
 0x174   :  { %2403 = vmatprep.subr.bf16.mxu0 %v3562_v59  ;;  %2526 = vmatprep.subr.bf16.mxu1 %v3564_v12  ;;  %v3831_v58 = vld [vmem:[#allocation8 + $0xa0] sm:$0xff]   ;;  %v3832_v59 = vld [vmem:[#allocation8 + $0x68] sm:$0xff]  }
 0x175   :  { %v3833_v12 = vld [vmem:[#allocation8 + $0xe8] sm:$0xff]  }
 0x177   :  { %2404 = vmatpush1.bf16.msra.mxu0 %v3561_v63  ;;  %2527 = vmatpush1.bf16.msra.mxu1 %v3563_v24  ;;  %v3838_v63 = vld [vmem:[#allocation8 + $0x30] sm:$0xff]  }
 0x178   :  { %2405 = vmatprep.subr.bf16.mxu0 %v3570_v0  ;;  %2528 = vmatprep.subr.bf16.mxu1 %v3572_v1  ;;  %v3839_v24 = vld [vmem:[#allocation8 + $0xb0] sm:$0xff]   ;;  %v3840_v0 = vld [vmem:[#allocation8 + $0x78] sm:$0xff]  }
 0x179   :  { %v3841_v1 = vld [vmem:[#allocation8 + $0xf8] sm:$0xff]  }
 0x17b   :  { %2406 = vmatpush1.bf16.msra.mxu0 %v3569_v5  ;;  %2529 = vmatpush1.bf16.msra.mxu1 %v3571_v6  ;;  %v413_v5 = vlaneseq }
 0x17c   :  { %2407 = vmatprep.subr.bf16.mxu0 %v3578_v7  ;;  %2530 = vmatprep.subr.bf16.mxu1 %v3580_v38  ;;  %v4126_v38 = vld [vmem:[#allocation7] sm:$0xff] }
 0x17d   :  { %v4123_v6 = vshrl.u32 %v413_v5, 7 }
 0x17f   :  { %2408 = vmatpush1.bf16.msra.mxu0 %v3577_v13  ;;  %2531 = vmatpush1.bf16.msra.mxu1 %v3579_v14  ;;  %v415_v7 = vsub.s32 0, %v4123_v6  ;;  %v423_v8 = vsub.s32 2, %v4123_v6  ;;  %v419_v9 = vsub.s32 1, %v4123_v6  ;;  %v427_v10 = vsub.s32 3, %v4123_v6 }
 0x180   :  { %2409 = vmatprep.subr.bf16.mxu0 %v3586_v16  ;;  %2532 = vmatprep.subr.bf16.mxu1 %v3588_v17  ;;  %v443_v5 = vsub.s32 7, %v4123_v6 }
 0x181   :  { %v416_v11 = vrot.slane %v4126_v38, %v415_v7  ;;  %v424_v13 = vrot.slane %v4126_v38, %v423_v8  ;;  %v420_v14 = vrot.slane %v4126_v38, %v419_v9  ;;  %v428_v16 = vrot.slane %v4126_v38, %v427_v10 }
 0x182   :  { %v444_v10 = vrot.slane %v4126_v38, %v443_v5 }
 0x183   :  { %2410 = vmatpush1.bf16.msra.mxu0 %v3585_v22  ;;  %2533 = vmatpush1.bf16.msra.mxu1 %v3587_v23 }
 0x184   :  { %2411 = vmatprep.subr.bf16.mxu0 %v3594_v25  ;;  %2534 = vmatprep.subr.bf16.mxu1 %v3596_v26 }
 0x187   :  { %2412 = vmatpush1.bf16.msra.mxu0 %v3593_v32  ;;  %2535 = vmatpush1.bf16.msra.mxu1 %v3595_v33 }
 0x188   :  { %2413 = vmatprep.subr.bf16.mxu0 %v3602_v15  ;;  %2536 = vmatprep.subr.bf16.mxu1 %v3604_v34 }
 0x18b   :  { %2414 = vmatpush1.bf16.msra.mxu0 %v3601_v35  ;;  %2537 = vmatpush1.bf16.msra.mxu1 %v3603_v36  ;;  %v3846_v35 = vld [vmem:[#allocation8 + $0x100] sm:$0xff]  }
 0x18c   :  { %3669 = vmatprep.subr.bf16.mxu0 %v3812_v37  ;;  %3691 = vmatprep.subr.bf16.mxu1 %v3813_v39  ;;  %v3847_v39 = vld [vmem:[#allocation8 + $0x180] sm:$0xff]  }
 0x18e   :  { %2432 = vmatmul.mubr.bf16.vlgmr.msra.gmra.mrb[4].mxu0 %v4107_v28  ;;  %2555 = vmatmul.mubr.bf16.vlgmr.msra.gmra.mrb[4].mxu1 %v4107_v28  ;;  %v3827_v28 = vld [vmem:[#allocation8 + $0x98] sm:$0xff]  }
 0x18f   :  { %3670 = vmatpush3.bf16.msra.mxu0 %v3814_v40  ;;  %3692 = vmatpush3.bf16.msra.mxu1 %v3815_v41  ;;  %v3848_v40 = vld [vmem:[#allocation8 + $0x148] sm:$0xff]  }
 0x190   :  { %3671 = vmatprep.subr.bf16.mxu0 %v3816_v42  ;;  %3693 = vmatprep.subr.bf16.mxu1 %v3817_v43  ;;  %v3849_v42 = vld [vmem:[#allocation8 + $0x1c8] sm:$0xff]  }
 0x191   :  { %v3850_v43 = vld [vmem:[#allocation8 + $0x108] sm:$0xff]  }
 0x193   :  { %3672 = vmatpush3.bf16.msra.mxu0 %v3818_v44  ;;  %3694 = vmatpush3.bf16.msra.mxu1 %v3819_v45  ;;  %v3851_v44 = vld [vmem:[#allocation8 + $0x188] sm:$0xff]   ;;  %v3852_v45 = vld [vmem:[#allocation8 + $0x150] sm:$0xff]  }
 0x194   :  { %3673 = vmatprep.subr.bf16.mxu0 %v3820_v46  ;;  %3695 = vmatprep.subr.bf16.mxu1 %v3821_v47  ;;  %v3853_v46 = vld [vmem:[#allocation8 + $0x1d0] sm:$0xff]  }
 0x195   :  { %v3854_v47 = vld [vmem:[#allocation8 + $0x110] sm:$0xff]  }
 0x197   :  { %3674 = vmatpush3.bf16.msra.mxu0 %v3822_v48  ;;  %3696 = vmatpush3.bf16.msra.mxu1 %v3823_v49  ;;  %v3855_v48 = vld [vmem:[#allocation8 + $0x190] sm:$0xff]   ;;  %v3856_v49 = vld [vmem:[#allocation8 + $0x158] sm:$0xff]  }
 0x198   :  { %3675 = vmatprep.subr.bf16.mxu0 %v3824_v50  ;;  %3697 = vmatprep.subr.bf16.mxu1 %v3825_v51  ;;  %v3857_v50 = vld [vmem:[#allocation8 + $0x1d8] sm:$0xff]  }
 0x199   :  { %v3858_v51 = vld [vmem:[#allocation8 + $0x118] sm:$0xff]  }
 0x19b   :  { %3676 = vmatpush3.bf16.msra.mxu0 %v3826_v52  ;;  %3698 = vmatpush3.bf16.msra.mxu1 %v3827_v28  ;;  %v3859_v52 = vld [vmem:[#allocation8 + $0x198] sm:$0xff]   ;;  %v3860_v28 = vld [vmem:[#allocation8 + $0x160] sm:$0xff]  }
 0x19c   :  { %3677 = vmatprep.subr.bf16.mxu0 %v3828_v54  ;;  %3699 = vmatprep.subr.bf16.mxu1 %v3829_v55  ;;  %v3861_v54 = vld [vmem:[#allocation8 + $0x1e0] sm:$0xff]  }
 0x19d   :  { %v3862_v55 = vld [vmem:[#allocation8 + $0x120] sm:$0xff]  }
 0x19f   :  { %3678 = vmatpush3.bf16.msra.mxu0 %v3830_v56  ;;  %3700 = vmatpush3.bf16.msra.mxu1 %v3831_v58  ;;  %v3863_v56 = vld [vmem:[#allocation8 + $0x1a0] sm:$0xff]   ;;  %v3864_v58 = vld [vmem:[#allocation8 + $0x168] sm:$0xff]  }
 0x1a0   :  { %3679 = vmatprep.subr.bf16.mxu0 %v3832_v59  ;;  %3701 = vmatprep.subr.bf16.mxu1 %v3833_v12  ;;  %v3865_v59 = vld [vmem:[#allocation8 + $0x1e8] sm:$0xff]  }
 0x1a1   :  { %v3866_v12 = vld [vmem:[#allocation8 + $0x128] sm:$0xff]  }
 0x1a3   :  { %3680 = vmatpush3.bf16.msra.mxu0 %v3834_v57  ;;  %3702 = vmatpush3.bf16.msra.mxu1 %v3835_v60  ;;  %v3867_v57 = vld [vmem:[#allocation8 + $0x1a8] sm:$0xff]   ;;  %v3868_v60 = vld [vmem:[#allocation8 + $0x170] sm:$0xff]  }
 0x1a4   :  { %3681 = vmatprep.subr.bf16.mxu0 %v3836_v61  ;;  %3703 = vmatprep.subr.bf16.mxu1 %v3837_v62  ;;  %v3869_v61 = vld [vmem:[#allocation8 + $0x1f0] sm:$0xff]  }
 0x1a5   :  { %v3870_v62 = vld [vmem:[#allocation8 + $0x130] sm:$0xff]  }
 0x1a7   :  { %3682 = vmatpush3.bf16.msra.mxu0 %v3838_v63  ;;  %3704 = vmatpush3.bf16.msra.mxu1 %v3839_v24  ;;  %v3871_v63 = vld [vmem:[#allocation8 + $0x1b0] sm:$0xff]   ;;  %v3872_v24 = vld [vmem:[#allocation8 + $0x178] sm:$0xff]  }
 0x1a8   :  { %3683 = vmatprep.subr.bf16.mxu0 %v3840_v0  ;;  %3705 = vmatprep.subr.bf16.mxu1 %v3841_v1  ;;  %v3873_v0 = vld [vmem:[#allocation8 + $0x1f8] sm:$0xff]  }
 0x1a9   :  { %v3874_v1 = vld [vmem:[#allocation8 + $0x138] sm:$0xff]  }
 0x1ab   :  { %3684 = vmatpush3.bf16.msra.mxu0 %v3842_v2  ;;  %3706 = vmatpush3.bf16.msra.mxu1 %v3843_v3  ;;  %v3875_v2 = vld [vmem:[#allocation8 + $0x1b8] sm:$0xff]   ;;  %v431_v3 = vsub.s32 4, %v4123_v6 }
 0x1ac   :  { %3713 = vmatprep.subr.bf16.mxu0 %v3844_v53  ;;  %3735 = vmatprep.subr.bf16.mxu1 %v3845_v4  ;;  %v439_v53 = vsub.s32 6, %v4123_v6  ;;  %v435_v4 = vsub.s32 5, %v4123_v6 }
 0x1ad   :  { %v432_v7 = vrot.slane %v4126_v38, %v431_v3 }
 0x1ae   :  { %v440_v8 = vrot.slane %v4126_v38, %v439_v53  ;;  %v436_v9 = vrot.slane %v4126_v38, %v435_v4 }
 0x1c1   :  { %v2187_v17 = vpop.f32.mrb[0].mxu0  ;;  %v2310_v19 = vpop.f32.mrb[0].mxu1 }
 0x1c2   :  { %v3757_v18 = vadd.f32 %v2187_v17, %v416_v11  ;;  %v2189_v20 = vpop.f32.mrb[1].mxu0  ;;  %v3759_v21 = vadd.f32 %v2310_v19, %v424_v13  ;;  %v2312_v23 = vpop.f32.mrb[1].mxu1 }
 0x1c3   :  { %v3758_v22 = vadd.f32 %v2189_v20, %v420_v14  ;;  %v2191_v25 = vpop.f32.mrb[2].mxu0  ;;  %v3760_v27 = vadd.f32 %v2312_v23, %v428_v16  ;;  %v2314_v29 = vpop.f32.mrb[2].mxu1 }
 0x1c4   :  { %v2563_v26 = vmax.f32 %v3757_v18, 0.0  ;;  %v2192_v30 = vpop.f32.mrb[3].mxu0  ;;  %v2565_v31 = vmax.f32 %v3759_v21, 0.0  ;;  %v2315_v33 = vpop.f32.mrb[3].mxu1 }
 0x1c5   :  { %v2564_v32 = vmax.f32 %v3758_v22, 0.0  ;;  %v2566_v15 = vmax.f32 %v3760_v27, 0.0 }
 0x1c6   :  { %v2571_v36 = vpack.c.bf16 %v2563_v26, %v2563_v26  ;;  %v2573_v41 = vpack.c.bf16 %v2565_v31, %v2565_v31 }
 0x1c7   :  { %v2572_v34 = vpack.c.bf16 %v2564_v32, %v2564_v32  ;;  %v2574_v37 = vpack.c.bf16 %v2566_v15, %v2566_v15 }
 0x1c9   :  { %3123 = vmatprep.mubr.bf16.mxu0 %v2572_v34  ;;  %3163 = vmatprep.mubr.bf16.mxu1 %v2574_v37 }
 0x1ca   :  { %3124 = vmatmul.mubr.bf16.vlgmr.msra.gmra.mrb[8].mxu0 %v2571_v36  ;;  %3164 = vmatmul.mubr.bf16.vlgmr.msra.gmra.mrb[8].mxu1 %v2573_v41 }
 0x1cb   :  { %3714 = vmatpush3.bf16.msra.mxu0 %v3846_v35  ;;  %3736 = vmatpush3.bf16.msra.mxu1 %v3847_v39 }
 0x1cc   :  { %3715 = vmatprep.subr.bf16.mxu0 %v3848_v40  ;;  %3737 = vmatprep.subr.bf16.mxu1 %v3849_v42 }
 0x1cf   :  { %3716 = vmatpush3.bf16.msra.mxu0 %v3850_v43  ;;  %3738 = vmatpush3.bf16.msra.mxu1 %v3851_v44 }
 0x1d0   :  { %3717 = vmatprep.subr.bf16.mxu0 %v3852_v45  ;;  %3739 = vmatprep.subr.bf16.mxu1 %v3853_v46 }
 0x1d3   :  { %3718 = vmatpush3.bf16.msra.mxu0 %v3854_v47  ;;  %3740 = vmatpush3.bf16.msra.mxu1 %v3855_v48 }
 0x1d4   :  { %3719 = vmatprep.subr.bf16.mxu0 %v3856_v49  ;;  %3741 = vmatprep.subr.bf16.mxu1 %v3857_v50 }
 0x1d7   :  { %3720 = vmatpush3.bf16.msra.mxu0 %v3858_v51  ;;  %3742 = vmatpush3.bf16.msra.mxu1 %v3859_v52 }
 0x1d8   :  { %3721 = vmatprep.subr.bf16.mxu0 %v3860_v28  ;;  %3743 = vmatprep.subr.bf16.mxu1 %v3861_v54 }
 0x1db   :  { %3722 = vmatpush3.bf16.msra.mxu0 %v3862_v55  ;;  %3744 = vmatpush3.bf16.msra.mxu1 %v3863_v56 }
 0x1dc   :  { %3723 = vmatprep.subr.bf16.mxu0 %v3864_v58  ;;  %3745 = vmatprep.subr.bf16.mxu1 %v3865_v59 }
 0x1df   :  { %3724 = vmatpush3.bf16.msra.mxu0 %v3866_v12  ;;  %3746 = vmatpush3.bf16.msra.mxu1 %v3867_v57 }
 0x1e0   :  { %3725 = vmatprep.subr.bf16.mxu0 %v3868_v60  ;;  %3747 = vmatprep.subr.bf16.mxu1 %v3869_v61 }
 0x1e3   :  { %3726 = vmatpush3.bf16.msra.mxu0 %v3870_v62  ;;  %3748 = vmatpush3.bf16.msra.mxu1 %v3871_v63 }
 0x1e4   :  { %3727 = vmatprep.subr.bf16.mxu0 %v3872_v24  ;;  %3749 = vmatprep.subr.bf16.mxu1 %v3873_v0 }
 0x1e7   :  { %3728 = vmatpush3.bf16.msra.mxu0 %v3874_v1  ;;  %3750 = vmatpush3.bf16.msra.mxu1 %v3875_v2 }
 0x261   :  { %v2433_v11 = vpop.f32.mrb[4].mxu0  ;;  %v2556_v14 = vpop.f32.mrb[4].mxu1 }
 0x262   :  { %v3761_v13 = vadd.f32 %v2433_v11, %v432_v7  ;;  %v2435_v16 = vpop.f32.mrb[5].mxu0  ;;  %v3763_v17 = vadd.f32 %v2556_v14, %v440_v8  ;;  %v2558_v19 = vpop.f32.mrb[5].mxu1 }
 0x263   :  { %v3762_v18 = vadd.f32 %v2435_v16, %v436_v9  ;;  %v2437_v20 = vpop.f32.mrb[6].mxu0  ;;  %v3764_v22 = vadd.f32 %v2558_v19, %v444_v10  ;;  %v2560_v23 = vpop.f32.mrb[6].mxu1 }
 0x264   :  { %v2567_v21 = vmax.f32 %v3761_v13, 0.0  ;;  %v2438_v6 = vpop.f32.mrb[7].mxu0  ;;  %v2569_v25 = vmax.f32 %v3763_v17, 0.0  ;;  %v2561_v27 = vpop.f32.mrb[7].mxu1 }
 0x265   :  { %v2568_v26 = vmax.f32 %v3762_v18, 0.0  ;;  %v2570_v29 = vmax.f32 %v3764_v22, 0.0 }
 0x266   :  { %v2575_v31 = vpack.c.bf16 %v2567_v21, %v2567_v21  ;;  %v2577_v38 = vpack.c.bf16 %v2569_v25, %v2569_v25 }
 0x267   :  { %v2576_v30 = vpack.c.bf16 %v2568_v26, %v2568_v26  ;;  %v2578_v32 = vpack.c.bf16 %v2570_v29, %v2570_v29 }
 0x269   :  { %3203 = vmatprep.mubr.bf16.mxu0 %v2576_v30  ;;  %3243 = vmatprep.mubr.bf16.mxu1 %v2578_v32 }
 0x26a   :  { %3204 = vmatmul.mubr.bf16.vlgmr.msra.gmra.mrb[12].mxu0 %v2575_v31  ;;  %3244 = vmatmul.mubr.bf16.vlgmr.msra.gmra.mrb[12].mxu1 %v2577_v38 }
 0x29d   :  { %v3685_v33 = vpop.f32.mrb[8].mxu0  ;;  %v3707_v15 = vpop.f32.mrb[8].mxu1 }
 0x29e   :  { %v3686_v34 = vpop.f32.mrb[9].mxu0  ;;  %v3708_v36 = vpop.f32.mrb[9].mxu1 }
 0x29f   :  { %v3687_v35 = vadd.f32 %v3686_v34, %v3685_v33  ;;  %v3688_v37 = vpop.f32.mrb[10].mxu0  ;;  %v3709_v39 = vadd.f32 %v3708_v36, %v3707_v15  ;;  %v3710_v40 = vpop.f32.mrb[10].mxu1 }
 0x2a0   :  { %v3689_v41 = vpop.f32.mrb[11].mxu0  ;;  %v3711_v42 = vpop.f32.mrb[11].mxu1 }
 0x2a1   :  { %v3166_v43 = vadd.f32 %v3709_v39, %v3687_v35 }
 0x33d   :  { %v3729_v44 = vpop.f32.mrb[12].mxu0  ;;  %v3751_v45 = vpop.f32.mrb[12].mxu1 }
 0x33e   :  { %v3730_v46 = vpop.f32.mrb[13].mxu0  ;;  %v3752_v48 = vpop.f32.mrb[13].mxu1 }
 0x33f   :  { %v3731_v47 = vadd.f32 %v3730_v46, %v3729_v44  ;;  %v3732_v49 = vpop.f32.mrb[14].mxu0  ;;  %v3753_v50 = vadd.f32 %v3752_v48, %v3751_v45  ;;  %v3754_v51 = vpop.f32.mrb[14].mxu1 }
 0x340   :  { %v3733_v52 = vpop.f32.mrb[15].mxu0  ;;  %v3755_v54 = vpop.f32.mrb[15].mxu1 }
 0x341   :  { %v3206_v28 = vadd.f32 %v3731_v47, %v3166_v43 }
 0x343   :  { %v3246_v55 = vadd.f32 %v3753_v50, %v3206_v28 }
 0x345   :  { %3255 = vst [vmem:[#allocation10] sm:$0xff] %v3246_v55 }
 0x346   :  { %3975 = shalt.err (!%p3972_p8)
}
 0x347   :  { %s3976_s15 = scalar_lea.hbm %s4159_s4, 128 }
 0x348   :  { %p3977_p9 = scmp.ne.s32.totalorder %s4159_s4, %s3976_s15  ;;  %p3980_p10 = scmp.lt.u32.totalorder %s3976_s15, %s4159_s4 }
 0x34a   :  { %p3982_p11 = pnand %p3980_p10, %p3977_p9 }
 0x34c   :  { %3985 = shalt.err (!%p3982_p11)
}
 0x34d   :  { %3272 = dma.vmem_to_hbm [thread:$0]  %s3270_s12, 128, %s4159_s4, [#allocation4]  }
 0x34e   :  { %3992 = dma.done.wait [#allocation4], 128  }
 0x34f   :  { %3993 = vsyncadd [#allocation4], 4294967168 }
 0x350   :  { %3276 = vsyncpa [#allocation3], 1 }
 0x351   :  { %3277 = vsyncpa [#allocation6], 1 }
 0x352   :  { %3278 = vsyncpa [#allocation9], 1 }
 0x353   :  { %3279 = vsyncpa [#allocation4], 1 }

</bundles_post_ra>
